<compile_context>
chip_gen: v7x
topology: tpu7x:2x2x1
jax: 0.10.0
libtpu: 0.0.40
codegen_flags: <defaults>
</compile_context>

<pallas_src>
import functools

import jax
import jax.numpy as jnp
from jax import lax
from jax.experimental import pallas as pl
from jax.experimental.pallas import tpu as pltpu


def _choose_tile(n, candidates):
    for c in candidates:
        if n % c == 0:
            return c
    return n  # fallback: full extent (always a legal BlockSpec dim)


def _leaky(v):
    # LeakyReLU(0.2) == max(v, 0.2*v) for 0 < slope < 1 (single vmax on VPU).
    return jnp.maximum(v, 0.2 * v)


# --------------------------------------------------------------------------
# Kernel 1: lane-dense conv matmul   out^T(Cout, tm) = W(Cout, tk) @ A^T(tk, tm)
#   Fused epilogue: optional bias add, optional LeakyReLU(0.2), optional
#   BatchNorm statistics (per-channel sum / sum-of-squares accumulators).
# --------------------------------------------------------------------------
def _conv_kernel(*refs, use_bias, leaky, with_stats):
    idx = 0
    w_ref = refs[idx]; idx += 1
    at_ref = refs[idx]; idx += 1
    b_ref = None
    if use_bias:
        b_ref = refs[idx]; idx += 1
    o_ref = refs[idx]; idx += 1
    sum_ref = sq_ref = None
    if with_stats:
        sum_ref = refs[idx]; idx += 1
        sq_ref = refs[idx]; idx += 1
    acc_ref = refs[idx]

    mi = pl.program_id(0)
    ki = pl.program_id(1)
    nk = pl.num_programs(1)

    @pl.when(ki == 0)
    def _():
        acc_ref[...] = jnp.zeros_like(acc_ref)

    if with_stats:
        @pl.when(jnp.logical_and(mi == 0, ki == 0))
        def _():
            sum_ref[...] = jnp.zeros_like(sum_ref)
            sq_ref[...] = jnp.zeros_like(sq_ref)

    acc_ref[...] += jnp.dot(w_ref[...], at_ref[...],
                            preferred_element_type=jnp.float32)

    @pl.when(ki == nk - 1)
    def _():
        y = acc_ref[...]
        if use_bias:
            y = y + b_ref[...]                       # (Cout,1) lane-broadcast
        if with_stats:
            # cross-lane reductions run on the XLU slot (free next to the MXU).
            sum_ref[...] += jnp.sum(y, axis=1, keepdims=True)
            sq_ref[...] += jnp.sum(y * y, axis=1, keepdims=True)
        if leaky:
            y = _leaky(y)
        o_ref[...] = y.astype(o_ref.dtype)


def conv_matmul_T(at, w, b=None, *, leaky, with_stats, out_dtype=jnp.bfloat16):
    """at: (K, M) bf16 patches^T, w: (Cout, K) bf16, b: (Cout, 1) f32 or None."""
    K, M = at.shape
    Cout, Kw = w.shape
    assert K == Kw
    # Bigger lane-dense tiles -> better HBM roofline; all comfortably in VMEM
    # (weights are tiny, at-tile <= tk*tm*2B, acc <= Cout*tm*4B).
    tm = _choose_tile(M, (2048, 1024, 512, 256, 128))
    tk = _choose_tile(K, (512, 256, 128))
    grid = (M // tm, K // tk)

    in_specs = [
        pl.BlockSpec((Cout, tk), lambda mi, ki: (0, ki)),   # weights
        pl.BlockSpec((tk, tm), lambda mi, ki: (ki, mi)),    # patches^T
    ]
    inputs = [w, at]
    use_bias = b is not None
    if use_bias:
        in_specs.append(pl.BlockSpec((Cout, 1), lambda mi, ki: (0, 0)))
        inputs.append(b)

    out_shape = [jax.ShapeDtypeStruct((Cout, M), out_dtype)]
    out_specs = [pl.BlockSpec((Cout, tm), lambda mi, ki: (0, mi))]
    if with_stats:
        out_shape += [jax.ShapeDtypeStruct((Cout, 1), jnp.float32)] * 2
        out_specs += [pl.BlockSpec((Cout, 1), lambda mi, ki: (0, 0)),
                      pl.BlockSpec((Cout, 1), lambda mi, ki: (0, 0))]

    kernel = functools.partial(_conv_kernel, use_bias=use_bias,
                               leaky=leaky, with_stats=with_stats)
    # M axis reduces into the shared (Cout,1) stat accumulators when fused,
    # so it must be "arbitrary" in that case; K (reduction) axis is last.
    dims = ("arbitrary" if with_stats else "parallel", "arbitrary")

    return pl.pallas_call(
        kernel,
        out_shape=tuple(out_shape),
        grid_spec=pltpu.PrefetchScalarGridSpec(
            num_scalar_prefetch=0,
            grid=grid,
            in_specs=in_specs,
            out_specs=tuple(out_specs),
            scratch_shapes=[pltpu.VMEM((Cout, tm), jnp.float32)],
        ),
        compiler_params=pltpu.CompilerParams(
            dimension_semantics=dims,
            vmem_limit_bytes=32 * 1024 * 1024),
    )(*inputs)


# --------------------------------------------------------------------------
# Kernel 2: fused BatchNorm affine (precomputed scale/shift) + LeakyReLU(0.2)
#   operates on the lane-dense (C, M) activation layout.
# --------------------------------------------------------------------------
def _bn_lrelu_kernel(y_ref, scale_ref, shift_ref, o_ref):
    v = y_ref[...].astype(jnp.float32) * scale_ref[...] + shift_ref[...]
    o_ref[...] = _leaky(v).astype(o_ref.dtype)


def bn_lrelu_apply(y, scale, shift):
    C, M = y.shape
    tm = _choose_tile(M, (8192, 4096, 2048, 1024, 512, 256, 128))
    return pl.pallas_call(
        _bn_lrelu_kernel,
        out_shape=jax.ShapeDtypeStruct((C, M), y.dtype),
        grid_spec=pltpu.PrefetchScalarGridSpec(
            num_scalar_prefetch=0,
            grid=(M // tm,),
            in_specs=[pl.BlockSpec((C, tm), lambda i: (0, i)),
                      pl.BlockSpec((C, 1), lambda i: (0, 0)),
                      pl.BlockSpec((C, 1), lambda i: (0, 0))],
            out_specs=pl.BlockSpec((C, tm), lambda i: (0, i)),
        ),
        compiler_params=pltpu.CompilerParams(
            dimension_semantics=("parallel",),
            vmem_limit_bytes=32 * 1024 * 1024),
    )(y, scale, shift)


# --------------------------------------------------------------------------
# Plain-JAX glue: patch extraction directly in transposed (K, M) layout.
#   Output channel ordering of conv_general_dilated_patches is (c, kh, kw),
#   matching PyTorch's OIHW weight reshape (Cout, Cin*kh*kw).
# --------------------------------------------------------------------------
def _patches_T(x, lhs_layout, k, stride, pad):
    p = lax.conv_general_dilated_patches(
        x, (k, k), (stride, stride), [(pad, pad), (pad, pad)],
        dimension_numbers=(lhs_layout, "OIHW", "CNHW"))
    Kc, N, Ho, Wo = p.shape                       # channels-first output layout
    return p.reshape(Kc, N * Ho * Wo), N, Ho, Wo


def discriminator_forward(x, p):
    bf16 = jnp.bfloat16

    # layer 1: Conv2d(imgC, F, 4, 2, 1) + bias, LeakyReLU(0.2)  (all fused)
    at, N, Ho, Wo = _patches_T(x, "NCHW", 4, 2, 1)
    w = p["w1"].reshape(p["w1"].shape[0], -1).astype(bf16)
    (y,) = conv_matmul_T(at.astype(bf16), w, p["b1"].reshape(-1, 1),
                         leaky=True, with_stats=False)
    x_cnhw = y.reshape(-1, N, Ho, Wo)             # bf16, channels-first layout

    # blocks 2..4: Conv2d(no bias) [+ fused BN stats] -> BN affine + LeakyReLU
    for i in (2, 3, 4):
        at, N, Ho, Wo = _patches_T(x_cnhw, "CNHW", 4, 2, 1)
        w = p[f"w{i}"].reshape(p[f"w{i}"].shape[0], -1).astype(bf16)
        y, s, sq = conv_matmul_T(at, w, None, leaky=False, with_stats=True)
        M = y.shape[1]
        mean = s / M
        var = jnp.maximum(sq / M - mean * mean, 0.0)      # biased var (training BN)
        scale = p[f"g{i}"].reshape(-1, 1) * lax.rsqrt(var + 1e-5)
        shift = p[f"beta{i}"].reshape(-1, 1) - mean * scale
        y = bn_lrelu_apply(y, scale, shift)
        x_cnhw = y.reshape(-1, N, Ho, Wo)

    # layer 5: Conv2d(8F, 1, 4, 2, 0) + bias.  Cout=1 and M=N: a Pallas call
    # here is pure overhead (1-lane masked store), so do the tiny dot directly.
    at, N, Ho, Wo = _patches_T(x_cnhw, "CNHW", 4, 2, 0)
    w5 = p["w5"].reshape(1, -1).astype(jnp.float32)
    out = jnp.dot(w5, at.astype(jnp.float32)) + p["b5"].reshape(1, 1)
    return jnp.transpose(out).reshape(N, 1, Ho, Wo)


# --------------------------------------------------------------------------
# Pure-JAX f32 reference (sanity check)
# --------------------------------------------------------------------------
def ref_forward(x, p):
    def conv(x, w, b, stride, pad):
        y = lax.conv_general_dilated(x, w, (stride, stride),
                                     [(pad, pad), (pad, pad)],
                                     dimension_numbers=("NCHW", "OIHW", "NCHW"))
        return y if b is None else y + b.reshape(1, -1, 1, 1)

    def lrelu(v):
        return jnp.where(v >= 0, v, 0.2 * v)

    def bn(v, g, b, eps=1e-5):
        mean = v.mean(axis=(0, 2, 3), keepdims=True)
        var = v.var(axis=(0, 2, 3), keepdims=True)
        return (v - mean) / jnp.sqrt(var + eps) * g.reshape(1, -1, 1, 1) + b.reshape(1, -1, 1, 1)

    y = lrelu(conv(x, p["w1"], p["b1"], 2, 1))
    for i in (2, 3, 4):
        y = lrelu(bn(conv(y, p[f"w{i}"], None, 2, 1), p[f"g{i}"], p[f"beta{i}"]))
    return conv(y, p["w5"], p["b5"], 2, 0)


def make_params(key, img_channels, features):
    chans = [(img_channels, features), (features, 2 * features),
             (2 * features, 4 * features), (4 * features, 8 * features),
             (8 * features, 1)]
    params = {}
    keys = jax.random.split(key, 16)
    ki = 0
    for idx, (cin, cout) in enumerate(chans, start=1):
        fan_in = cin * 16
        params[f"w{idx}"] = (jax.random.normal(keys[ki], (cout, cin, 4, 4), jnp.float32)
                             / jnp.sqrt(fan_in))
        ki += 1
    params["b1"] = 0.01 * jax.random.normal(keys[ki], (features,), jnp.float32); ki += 1
    params["b5"] = 0.01 * jax.random.normal(keys[ki], (1,), jnp.float32); ki += 1
    for idx, cout in zip((2, 3, 4), (2 * features, 4 * features, 8 * features)):
        params[f"g{idx}"] = 1.0 + 0.1 * jax.random.normal(keys[ki], (cout,), jnp.float32); ki += 1
        params[f"beta{idx}"] = 0.1 * jax.random.normal(keys[ki], (cout,), jnp.float32); ki += 1
    return params


if __name__ == "__main__":
    # Architecture requires spatial 64: four stride-2 pad-1 convs, then a
    # stride-2 kernel-4 valid conv -> 1x1 output.
    N, IMG_C, FEATURES, H, W = 2, 4, 8, 64, 64

    key = jax.random.PRNGKey(0)
    k_x, k_p = jax.random.split(key)
    x = jax.random.normal(k_x, (N, IMG_C, H, W), jnp.float32)
    params = make_params(k_p, IMG_C, FEATURES)

    fwd = jax.jit(discriminator_forward)
    out = jax.block_until_ready(fwd(x, params))
    ref = jax.block_until_ready(ref_forward(x, params))

    assert out.shape == (N, 1, 1, 1), out.shape
    # bf16 matmul inputs with f32 accumulation -> tolerance relaxed vs pure f32.
    assert jnp.allclose(out.astype(jnp.float32), ref, atol=5e-2, rtol=5e-2), (
        f"max abs diff {jnp.max(jnp.abs(out.astype(jnp.float32) - ref))}")
    print("KERNEL_OK")
</pallas_src>

<mosaic_0001>
module attributes {stable_mosaic.version = 11 : i64} {
  func.func @_conv_kernel(%arg0: i32, %arg1: i32, %arg2: memref<8x64xbf16, #tpu.memory_space<vmem>>, %arg3: memref<64x2048xbf16, #tpu.memory_space<vmem>>, %arg4: memref<8x1xf32, #tpu.memory_space<vmem>>, %arg5: memref<8x2048xbf16, #tpu.memory_space<vmem>>, %arg6: memref<8x2048xf32, #tpu.memory_space<vmem>>) attributes {dimension_semantics = [#tpu.dimension_semantics<parallel>, #tpu.dimension_semantics<arbitrary>], iteration_bounds = array<i64: 1, 1>, scalar_prefetch = 0 : i64, scratch_operands = 1 : i64, tpu.core_type = #tpu.core_type<tc>, window_params = [{transform_indices = @transform_0, window_bounds = array<i64: 8, 64>}, {transform_indices = @transform_1, window_bounds = array<i64: 64, 2048>}, {pipeline_mode = #tpu.pipeline_mode<synchronous>, transform_indices = @transform_2, window_bounds = array<i64: 8, 1>}, {transform_indices = @transform_3, window_bounds = array<i64: 8, 2048>}]} {
    %c0_i32 = arith.constant 0 : i32
    %0 = arith.cmpi eq, %arg1, %c0_i32 : i32
    %1 = arith.extui %0 : i1 to i32
    %c0_i32_0 = arith.constant 0 : i32
    %2 = arith.cmpi ne, %1, %c0_i32_0 : i32
    scf.if %2 {
      %cst_10 = arith.constant 0.000000e+00 : f32
      %12 = vector.broadcast %cst_10 : f32 to vector<8x2048xf32>
      %c0_11 = arith.constant 0 : index
      %c0_12 = arith.constant 0 : index
      %13 = vector.load %arg6[%c0_11, %c0_12] : memref<8x2048xf32, #tpu.memory_space<vmem>>, vector<8x2048xf32>
      tpu.vector_store %arg6[%c0_11, %c0_12], %12 {strides = array<i32>} : memref<8x2048xf32, #tpu.memory_space<vmem>>, vector<8x2048xf32>,
    } else {
    }
    %c0 = arith.constant 0 : index
    %c0_1 = arith.constant 0 : index
    %3 = vector.load %arg6[%c0, %c0_1] : memref<8x2048xf32, #tpu.memory_space<vmem>>, vector<8x2048xf32>
    %c0_2 = arith.constant 0 : index
    %c0_3 = arith.constant 0 : index
    %4 = vector.load %arg2[%c0_2, %c0_3] : memref<8x64xbf16, #tpu.memory_space<vmem>>, vector<8x64xbf16>
    %c0_4 = arith.constant 0 : index
    %c0_5 = arith.constant 0 : index
    %5 = vector.load %arg3[%c0_4, %c0_5] : memref<64x2048xbf16, #tpu.memory_space<vmem>>, vector<64x2048xbf16>
    %cst = arith.constant dense<0.000000e+00> : vector<8x2048xf32>
    %6 = tpu.matmul %4, %5, %cst {dimension_numbers = #tpu.dot_dimension_numbers<[1], [0], [0], [1], [0, 0, 1, 1], [], []>} : vector<8x64xbf16>, vector<64x2048xbf16>, vector<8x2048xf32> -> vector<8x2048xf32>
    %7 = arith.addf %3, %6 : vector<8x2048xf32>
    %c0_6 = arith.constant 0 : index
    %c0_7 = arith.constant 0 : index
    %8 = vector.load %arg6[%c0_6, %c0_7] : memref<8x2048xf32, #tpu.memory_space<vmem>>, vector<8x2048xf32>
    tpu.vector_store %arg6[%c0_6, %c0_7], %7 {strides = array<i32>} : memref<8x2048xf32, #tpu.memory_space<vmem>>, vector<8x2048xf32>,
    %c0_i32_8 = arith.constant 0 : i32
    %9 = arith.cmpi eq, %arg1, %c0_i32_8 : i32
    %10 = arith.extui %9 : i1 to i32
    %c0_i32_9 = arith.constant 0 : i32
    %11 = arith.cmpi ne, %10, %c0_i32_9 : i32
    scf.if %11 {
      %c0_10 = arith.constant 0 : index
      %c0_11 = arith.constant 0 : index
      %12 = vector.load %arg6[%c0_10, %c0_11] : memref<8x2048xf32, #tpu.memory_space<vmem>>, vector<8x2048xf32>
      %c0_12 = arith.constant 0 : index
      %c0_13 = arith.constant 0 : index
      %13 = vector.load %arg4[%c0_12, %c0_13] : memref<8x1xf32, #tpu.memory_space<vmem>>, vector<8x1xf32>
      %14 = vector.broadcast %13 : vector<8x1xf32> to vector<8x2048xf32>
      %15 = arith.addf %12, %14 : vector<8x2048xf32>
      %cst_14 = arith.constant 2.000000e-01 : f32
      %16 = vector.broadcast %cst_14 : f32 to vector<8x2048xf32>
      %17 = arith.mulf %16, %15 : vector<8x2048xf32>
      %18 = arith.maximumf %15, %17 : vector<8x2048xf32>
      %19 = arith.truncf %18 : vector<8x2048xf32> to vector<8x2048xbf16>
      %c0_15 = arith.constant 0 : index
      %c0_16 = arith.constant 0 : index
      %20 = vector.load %arg5[%c0_15, %c0_16] : memref<8x2048xbf16, #tpu.memory_space<vmem>>, vector<8x2048xbf16>
      tpu.vector_store %arg5[%c0_15, %c0_16], %19 {strides = array<i32>} : memref<8x2048xbf16, #tpu.memory_space<vmem>>, vector<8x2048xbf16>,
    } else {
    }
    return
  }
  func.func @transform_0(%arg0: i32, %arg1: i32) -> (i32, i32) {
    %c0_i32 = arith.constant 0 : i32
    %c0_i32_0 = arith.constant 0 : i32
    return %c0_i32, %arg1 : i32, i32
  }
  func.func @transform_1(%arg0: i32, %arg1: i32) -> (i32, i32) {
    %c0_i32 = arith.constant 0 : i32
    return %arg1, %arg0 : i32, i32
  }
  func.func @transform_2(%arg0: i32, %arg1: i32) -> (i32, i32) {
    %c0_i32 = arith.constant 0 : i32
    %c0_i32_0 = arith.constant 0 : i32
    %c0_i32_1 = arith.constant 0 : i32
    return %c0_i32, %c0_i32_0 : i32, i32
  }
  func.func @transform_3(%arg0: i32, %arg1: i32) -> (i32, i32) {
    %c0_i32 = arith.constant 0 : i32
    %c0_i32_0 = arith.constant 0 : i32
    return %c0_i32, %arg0 : i32, i32
  }
}

module attributes {stable_mosaic.version = 11 : i64} {
  func.func @_conv_kernel(%arg0: i32, %arg1: i32, %arg2: memref<16x128xbf16, #tpu.memory_space<vmem>>, %arg3: memref<128x512xbf16, #tpu.memory_space<vmem>>, %arg4: memref<16x512xbf16, #tpu.memory_space<vmem>>, %arg5: memref<16x1xf32, #tpu.memory_space<vmem>>, %arg6: memref<16x1xf32, #tpu.memory_space<vmem>>, %arg7: memref<16x512xf32, #tpu.memory_space<vmem>>) attributes {dimension_semantics = [#tpu.dimension_semantics<arbitrary>, #tpu.dimension_semantics<arbitrary>], iteration_bounds = array<i64: 1, 1>, scalar_prefetch = 0 : i64, scratch_operands = 1 : i64, tpu.core_type = #tpu.core_type<tc>, window_params = [{transform_indices = @transform_0, window_bounds = array<i64: 16, 128>}, {transform_indices = @transform_1, window_bounds = array<i64: 128, 512>}, {transform_indices = @transform_2, window_bounds = array<i64: 16, 512>}, {pipeline_mode = #tpu.pipeline_mode<synchronous>, transform_indices = @transform_3, window_bounds = array<i64: 16, 1>}, {pipeline_mode = #tpu.pipeline_mode<synchronous>, transform_indices = @transform_4, window_bounds = array<i64: 16, 1>}]} {
    %c0_i32 = arith.constant 0 : i32
    %0 = arith.cmpi eq, %arg1, %c0_i32 : i32
    %1 = arith.extui %0 : i1 to i32
    %c0_i32_0 = arith.constant 0 : i32
    %2 = arith.cmpi ne, %1, %c0_i32_0 : i32
    scf.if %2 {
      %cst_13 = arith.constant 0.000000e+00 : f32
      %17 = vector.broadcast %cst_13 : f32 to vector<16x512xf32>
      %c0_14 = arith.constant 0 : index
      %c0_15 = arith.constant 0 : index
      %18 = vector.load %arg7[%c0_14, %c0_15] : memref<16x512xf32, #tpu.memory_space<vmem>>, vector<16x512xf32>
      tpu.vector_store %arg7[%c0_14, %c0_15], %17 {strides = array<i32>} : memref<16x512xf32, #tpu.memory_space<vmem>>, vector<16x512xf32>,
    } else {
    }
    %c0_i32_1 = arith.constant 0 : i32
    %3 = arith.cmpi eq, %arg0, %c0_i32_1 : i32
    %c0_i32_2 = arith.constant 0 : i32
    %4 = arith.cmpi eq, %arg1, %c0_i32_2 : i32
    %5 = arith.andi %3, %4 : i1
    %6 = arith.extui %5 : i1 to i32
    %c0_i32_3 = arith.constant 0 : i32
    %7 = arith.cmpi ne, %6, %c0_i32_3 : i32
    scf.if %7 {
      %cst_13 = arith.constant 0.000000e+00 : f32
      %17 = vector.broadcast %cst_13 : f32 to vector<16x1xf32>
      %c0_14 = arith.constant 0 : index
      %c0_15 = arith.constant 0 : index
      %18 = vector.load %arg5[%c0_14, %c0_15] : memref<16x1xf32, #tpu.memory_space<vmem>>, vector<16x1xf32>
      tpu.vector_store %arg5[%c0_14, %c0_15], %17 {strides = array<i32>} : memref<16x1xf32, #tpu.memory_space<vmem>>, vector<16x1xf32>,
      %cst_16 = arith.constant 0.000000e+00 : f32
      %19 = vector.broadcast %cst_16 : f32 to vector<16x1xf32>
      %c0_17 = arith.constant 0 : index
      %c0_18 = arith.constant 0 : index
      %20 = vector.load %arg6[%c0_17, %c0_18] : memref<16x1xf32, #tpu.memory_space<vmem>>, vector<16x1xf32>
      tpu.vector_store %arg6[%c0_17, %c0_18], %19 {strides = array<i32>} : memref<16x1xf32, #tpu.memory_space<vmem>>, vector<16x1xf32>,
    } else {
    }
    %c0 = arith.constant 0 : index
    %c0_4 = arith.constant 0 : index
    %8 = vector.load %arg7[%c0, %c0_4] : memref<16x512xf32, #tpu.memory_space<vmem>>, vector<16x512xf32>
    %c0_5 = arith.constant 0 : index
    %c0_6 = arith.constant 0 : index
    %9 = vector.load %arg2[%c0_5, %c0_6] : memref<16x128xbf16, #tpu.memory_space<vmem>>, vector<16x128xbf16>
    %c0_7 = arith.constant 0 : index
    %c0_8 = arith.constant 0 : index
    %10 = vector.load %arg3[%c0_7, %c0_8] : memref<128x512xbf16, #tpu.memory_space<vmem>>, vector<128x512xbf16>
    %cst = arith.constant dense<0.000000e+00> : vector<16x512xf32>
    %11 = tpu.matmul %9, %10, %cst {dimension_numbers = #tpu.dot_dimension_numbers<[1], [0], [0], [1], [0, 0, 1, 1], [], []>} : vector<16x128xbf16>, vector<128x512xbf16>, vector<16x512xf32> -> vector<16x512xf32>
    %12 = arith.addf %8, %11 : vector<16x512xf32>
    %c0_9 = arith.constant 0 : index
    %c0_10 = arith.constant 0 : index
    %13 = vector.load %arg7[%c0_9, %c0_10] : memref<16x512xf32, #tpu.memory_space<vmem>>, vector<16x512xf32>
    tpu.vector_store %arg7[%c0_9, %c0_10], %12 {strides = array<i32>} : memref<16x512xf32, #tpu.memory_space<vmem>>, vector<16x512xf32>,
    %c0_i32_11 = arith.constant 0 : i32
    %14 = arith.cmpi eq, %arg1, %c0_i32_11 : i32
    %15 = arith.extui %14 : i1 to i32
    %c0_i32_12 = arith.constant 0 : i32
    %16 = arith.cmpi ne, %15, %c0_i32_12 : i32
    scf.if %16 {
      %c0_13 = arith.constant 0 : index
      %c0_14 = arith.constant 0 : index
      %17 = vector.load %arg7[%c0_13, %c0_14] : memref<16x512xf32, #tpu.memory_space<vmem>>, vector<16x512xf32>
      %c0_15 = arith.constant 0 : index
      %c0_16 = arith.constant 0 : index
      %18 = vector.load %arg5[%c0_15, %c0_16] : memref<16x1xf32, #tpu.memory_space<vmem>>, vector<16x1xf32>
      %cst_17 = arith.constant dense<0.000000e+00> : vector<16xf32>
      %19 = vector.multi_reduction <add>, %17, %cst_17 [1] : vector<16x512xf32> to vector<16xf32>
      %20 = vector.shape_cast %19 : vector<16xf32> to vector<16x1xf32>
      %21 = arith.addf %18, %20 : vector<16x1xf32>
      %c0_18 = arith.constant 0 : index
      %c0_19 = arith.constant 0 : index
      %22 = vector.load %arg5[%c0_18, %c0_19] : memref<16x1xf32, #tpu.memory_space<vmem>>, vector<16x1xf32>
      tpu.vector_store %arg5[%c0_18, %c0_19], %21 {strides = array<i32>} : memref<16x1xf32, #tpu.memory_space<vmem>>, vector<16x1xf32>,
      %c0_20 = arith.constant 0 : index
      %c0_21 = arith.constant 0 : index
      %23 = vector.load %arg6[%c0_20, %c0_21] : memref<16x1xf32, #tpu.memory_space<vmem>>, vector<16x1xf32>
      %24 = arith.mulf %17, %17 : vector<16x512xf32>
      %cst_22 = arith.constant dense<0.000000e+00> : vector<16xf32>
      %25 = vector.multi_reduction <add>, %24, %cst_22 [1] : vector<16x512xf32> to vector<16xf32>
      %26 = vector.shape_cast %25 : vector<16xf32> to vector<16x1xf32>
      %27 = arith.addf %23, %26 : vector<16x1xf32>
      %c0_23 = arith.constant 0 : index
      %c0_24 = arith.constant 0 : index
      %28 = vector.load %arg6[%c0_23, %c0_24] : memref<16x1xf32, #tpu.memory_space<vmem>>, vector<16x1xf32>
      tpu.vector_store %arg6[%c0_23, %c0_24], %27 {strides = array<i32>} : memref<16x1xf32, #tpu.memory_space<vmem>>, vector<16x1xf32>,
      %29 = arith.truncf %17 : vector<16x512xf32> to vector<16x512xbf16>
      %c0_25 = arith.constant 0 : index
      %c0_26 = arith.constant 0 : index
      %30 = vector.load %arg4[%c0_25, %c0_26] : memref<16x512xbf16, #tpu.memory_space<vmem>>, vector<16x512xbf16>
      tpu.vector_store %arg4[%c0_25, %c0_26], %29 {strides = array<i32>} : memref<16x512xbf16, #tpu.memory_space<vmem>>, vector<16x512xbf16>,
    } else {
    }
    return
  }
  func.func @transform_0(%arg0: i32, %arg1: i32) -> (i32, i32) {
    %c0_i32 = arith.constant 0 : i32
    %c0_i32_0 = arith.constant 0 : i32
    return %c0_i32, %arg1 : i32, i32
  }
  func.func @transform_1(%arg0: i32, %arg1: i32) -> (i32, i32) {
    %c0_i32 = arith.constant 0 : i32
    return %arg1, %arg0 : i32, i32
  }
  func.func @transform_2(%arg0: i32, %arg1: i32) -> (i32, i32) {
    %c0_i32 = arith.constant 0 : i32
    %c0_i32_0 = arith.constant 0 : i32
    return %c0_i32, %arg0 : i32, i32
  }
  func.func @transform_3(%arg0: i32, %arg1: i32) -> (i32, i32) {
    %c0_i32 = arith.constant 0 : i32
    %c0_i32_0 = arith.constant 0 : i32
    %c0_i32_1 = arith.constant 0 : i32
    return %c0_i32, %c0_i32_0 : i32, i32
  }
  func.func @transform_4(%arg0: i32, %arg1: i32) -> (i32, i32) {
    %c0_i32 = arith.constant 0 : i32
    %c0_i32_0 = arith.constant 0 : i32
    %c0_i32_1 = arith.constant 0 : i32
    return %c0_i32, %c0_i32_0 : i32, i32
  }
}

module attributes {stable_mosaic.version = 11 : i64} {
  func.func @_bn_lrelu_kernel(%arg0: i32, %arg1: memref<16x512xbf16, #tpu.memory_space<vmem>>, %arg2: memref<16x1xf32, #tpu.memory_space<vmem>>, %arg3: memref<16x1xf32, #tpu.memory_space<vmem>>, %arg4: memref<16x512xbf16, #tpu.memory_space<vmem>>) attributes {dimension_semantics = [#tpu.dimension_semantics<parallel>], iteration_bounds = array<i64: 1>, scalar_prefetch = 0 : i64, scratch_operands = 0 : i64, tpu.core_type = #tpu.core_type<tc>, window_params = [{transform_indices = @transform_0, window_bounds = array<i64: 16, 512>}, {pipeline_mode = #tpu.pipeline_mode<synchronous>, transform_indices = @transform_1, window_bounds = array<i64: 16, 1>}, {pipeline_mode = #tpu.pipeline_mode<synchronous>, transform_indices = @transform_2, window_bounds = array<i64: 16, 1>}, {transform_indices = @transform_3, window_bounds = array<i64: 16, 512>}]} {
    %c0 = arith.constant 0 : index
    %c0_0 = arith.constant 0 : index
    %0 = vector.load %arg1[%c0, %c0_0] : memref<16x512xbf16, #tpu.memory_space<vmem>>, vector<16x512xbf16>
    %1 = arith.extf %0 : vector<16x512xbf16> to vector<16x512xf32>
    %c0_1 = arith.constant 0 : index
    %c0_2 = arith.constant 0 : index
    %2 = vector.load %arg2[%c0_1, %c0_2] : memref<16x1xf32, #tpu.memory_space<vmem>>, vector<16x1xf32>
    %3 = vector.broadcast %2 : vector<16x1xf32> to vector<16x512xf32>
    %4 = arith.mulf %1, %3 : vector<16x512xf32>
    %c0_3 = arith.constant 0 : index
    %c0_4 = arith.constant 0 : index
    %5 = vector.load %arg3[%c0_3, %c0_4] : memref<16x1xf32, #tpu.memory_space<vmem>>, vector<16x1xf32>
    %6 = vector.broadcast %5 : vector<16x1xf32> to vector<16x512xf32>
    %7 = arith.addf %4, %6 : vector<16x512xf32>
    %cst = arith.constant 2.000000e-01 : f32
    %8 = vector.broadcast %cst : f32 to vector<16x512xf32>
    %9 = arith.mulf %8, %7 : vector<16x512xf32>
    %10 = arith.maximumf %7, %9 : vector<16x512xf32>
    %11 = arith.truncf %10 : vector<16x512xf32> to vector<16x512xbf16>
    %c0_5 = arith.constant 0 : index
    %c0_6 = arith.constant 0 : index
    %12 = vector.load %arg4[%c0_5, %c0_6] : memref<16x512xbf16, #tpu.memory_space<vmem>>, vector<16x512xbf16>
    tpu.vector_store %arg4[%c0_5, %c0_6], %11 {strides = array<i32>} : memref<16x512xbf16, #tpu.memory_space<vmem>>, vector<16x512xbf16>,
    return
  }
  func.func @transform_0(%arg0: i32) -> (i32, i32) {
    %c0_i32 = arith.constant 0 : i32
    %c0_i32_0 = arith.constant 0 : i32
    return %c0_i32, %arg0 : i32, i32
  }
  func.func @transform_1(%arg0: i32) -> (i32, i32) {
    %c0_i32 = arith.constant 0 : i32
    %c0_i32_0 = arith.constant 0 : i32
    %c0_i32_1 = arith.constant 0 : i32
    return %c0_i32, %c0_i32_0 : i32, i32
  }
  func.func @transform_2(%arg0: i32) -> (i32, i32) {
    %c0_i32 = arith.constant 0 : i32
    %c0_i32_0 = arith.constant 0 : i32
    %c0_i32_1 = arith.constant 0 : i32
    return %c0_i32, %c0_i32_0 : i32, i32
  }
  func.func @transform_3(%arg0: i32) -> (i32, i32) {
    %c0_i32 = arith.constant 0 : i32
    %c0_i32_0 = arith.constant 0 : i32
    return %c0_i32, %arg0 : i32, i32
  }
}

module attributes {stable_mosaic.version = 11 : i64} {
  func.func @_conv_kernel(%arg0: i32, %arg1: i32, %arg2: memref<32x256xbf16, #tpu.memory_space<vmem>>, %arg3: memref<256x128xbf16, #tpu.memory_space<vmem>>, %arg4: memref<32x128xbf16, #tpu.memory_space<vmem>>, %arg5: memref<32x1xf32, #tpu.memory_space<vmem>>, %arg6: memref<32x1xf32, #tpu.memory_space<vmem>>, %arg7: memref<32x128xf32, #tpu.memory_space<vmem>>) attributes {dimension_semantics = [#tpu.dimension_semantics<arbitrary>, #tpu.dimension_semantics<arbitrary>], iteration_bounds = array<i64: 1, 1>, scalar_prefetch = 0 : i64, scratch_operands = 1 : i64, tpu.core_type = #tpu.core_type<tc>, window_params = [{transform_indices = @transform_0, window_bounds = array<i64: 32, 256>}, {transform_indices = @transform_1, window_bounds = array<i64: 256, 128>}, {transform_indices = @transform_2, window_bounds = array<i64: 32, 128>}, {pipeline_mode = #tpu.pipeline_mode<synchronous>, transform_indices = @transform_3, window_bounds = array<i64: 32, 1>}, {pipeline_mode = #tpu.pipeline_mode<synchronous>, transform_indices = @transform_4, window_bounds = array<i64: 32, 1>}]} {
    %c0_i32 = arith.constant 0 : i32
    %0 = arith.cmpi eq, %arg1, %c0_i32 : i32
    %1 = arith.extui %0 : i1 to i32
    %c0_i32_0 = arith.constant 0 : i32
    %2 = arith.cmpi ne, %1, %c0_i32_0 : i32
    scf.if %2 {
      %cst_13 = arith.constant 0.000000e+00 : f32
      %17 = vector.broadcast %cst_13 : f32 to vector<32x128xf32>
      %c0_14 = arith.constant 0 : index
      %c0_15 = arith.constant 0 : index
      %18 = vector.load %arg7[%c0_14, %c0_15] : memref<32x128xf32, #tpu.memory_space<vmem>>, vector<32x128xf32>
      tpu.vector_store %arg7[%c0_14, %c0_15], %17 {strides = array<i32>} : memref<32x128xf32, #tpu.memory_space<vmem>>, vector<32x128xf32>,
    } else {
    }
    %c0_i32_1 = arith.constant 0 : i32
    %3 = arith.cmpi eq, %arg0, %c0_i32_1 : i32
    %c0_i32_2 = arith.constant 0 : i32
    %4 = arith.cmpi eq, %arg1, %c0_i32_2 : i32
    %5 = arith.andi %3, %4 : i1
    %6 = arith.extui %5 : i1 to i32
    %c0_i32_3 = arith.constant 0 : i32
    %7 = arith.cmpi ne, %6, %c0_i32_3 : i32
    scf.if %7 {
      %cst_13 = arith.constant 0.000000e+00 : f32
      %17 = vector.broadcast %cst_13 : f32 to vector<32x1xf32>
      %c0_14 = arith.constant 0 : index
      %c0_15 = arith.constant 0 : index
      %18 = vector.load %arg5[%c0_14, %c0_15] : memref<32x1xf32, #tpu.memory_space<vmem>>, vector<32x1xf32>
      tpu.vector_store %arg5[%c0_14, %c0_15], %17 {strides = array<i32>} : memref<32x1xf32, #tpu.memory_space<vmem>>, vector<32x1xf32>,
      %cst_16 = arith.constant 0.000000e+00 : f32
      %19 = vector.broadcast %cst_16 : f32 to vector<32x1xf32>
      %c0_17 = arith.constant 0 : index
      %c0_18 = arith.constant 0 : index
      %20 = vector.load %arg6[%c0_17, %c0_18] : memref<32x1xf32, #tpu.memory_space<vmem>>, vector<32x1xf32>
      tpu.vector_store %arg6[%c0_17, %c0_18], %19 {strides = array<i32>} : memref<32x1xf32, #tpu.memory_space<vmem>>, vector<32x1xf32>,
    } else {
    }
    %c0 = arith.constant 0 : index
    %c0_4 = arith.constant 0 : index
    %8 = vector.load %arg7[%c0, %c0_4] : memref<32x128xf32, #tpu.memory_space<vmem>>, vector<32x128xf32>
    %c0_5 = arith.constant 0 : index
    %c0_6 = arith.constant 0 : index
    %9 = vector.load %arg2[%c0_5, %c0_6] : memref<32x256xbf16, #tpu.memory_space<vmem>>, vector<32x256xbf16>
    %c0_7 = arith.constant 0 : index
    %c0_8 = arith.constant 0 : index
    %10 = vector.load %arg3[%c0_7, %c0_8] : memref<256x128xbf16, #tpu.memory_space<vmem>>, vector<256x128xbf16>
    %cst = arith.constant dense<0.000000e+00> : vector<32x128xf32>
    %11 = tpu.matmul %9, %10, %cst {dimension_numbers = #tpu.dot_dimension_numbers<[1], [0], [0], [1], [0, 0, 1, 1], [], []>} : vector<32x256xbf16>, vector<256x128xbf16>, vector<32x128xf32> -> vector<32x128xf32>
    %12 = arith.addf %8, %11 : vector<32x128xf32>
    %c0_9 = arith.constant 0 : index
    %c0_10 = arith.constant 0 : index
    %13 = vector.load %arg7[%c0_9, %c0_10] : memref<32x128xf32, #tpu.memory_space<vmem>>, vector<32x128xf32>
    tpu.vector_store %arg7[%c0_9, %c0_10], %12 {strides = array<i32>} : memref<32x128xf32, #tpu.memory_space<vmem>>, vector<32x128xf32>,
    %c0_i32_11 = arith.constant 0 : i32
    %14 = arith.cmpi eq, %arg1, %c0_i32_11 : i32
    %15 = arith.extui %14 : i1 to i32
    %c0_i32_12 = arith.constant 0 : i32
    %16 = arith.cmpi ne, %15, %c0_i32_12 : i32
    scf.if %16 {
      %c0_13 = arith.constant 0 : index
      %c0_14 = arith.constant 0 : index
      %17 = vector.load %arg7[%c0_13, %c0_14] : memref<32x128xf32, #tpu.memory_space<vmem>>, vector<32x128xf32>
      %c0_15 = arith.constant 0 : index
      %c0_16 = arith.constant 0 : index
      %18 = vector.load %arg5[%c0_15, %c0_16] : memref<32x1xf32, #tpu.memory_space<vmem>>, vector<32x1xf32>
      %cst_17 = arith.constant dense<0.000000e+00> : vector<32xf32>
      %19 = vector.multi_reduction <add>, %17, %cst_17 [1] : vector<32x128xf32> to vector<32xf32>
      %20 = vector.shape_cast %19 : vector<32xf32> to vector<32x1xf32>
      %21 = arith.addf %18, %20 : vector<32x1xf32>
      %c0_18 = arith.constant 0 : index
      %c0_19 = arith.constant 0 : index
      %22 = vector.load %arg5[%c0_18, %c0_19] : memref<32x1xf32, #tpu.memory_space<vmem>>, vector<32x1xf32>
      tpu.vector_store %arg5[%c0_18, %c0_19], %21 {strides = array<i32>} : memref<32x1xf32, #tpu.memory_space<vmem>>, vector<32x1xf32>,
      %c0_20 = arith.constant 0 : index
      %c0_21 = arith.constant 0 : index
      %23 = vector.load %arg6[%c0_20, %c0_21] : memref<32x1xf32, #tpu.memory_space<vmem>>, vector<32x1xf32>
      %24 = arith.mulf %17, %17 : vector<32x128xf32>
      %cst_22 = arith.constant dense<0.000000e+00> : vector<32xf32>
      %25 = vector.multi_reduction <add>, %24, %cst_22 [1] : vector<32x128xf32> to vector<32xf32>
      %26 = vector.shape_cast %25 : vector<32xf32> to vector<32x1xf32>
      %27 = arith.addf %23, %26 : vector<32x1xf32>
      %c0_23 = arith.constant 0 : index
      %c0_24 = arith.constant 0 : index
      %28 = vector.load %arg6[%c0_23, %c0_24] : memref<32x1xf32, #tpu.memory_space<vmem>>, vector<32x1xf32>
      tpu.vector_store %arg6[%c0_23, %c0_24], %27 {strides = array<i32>} : memref<32x1xf32, #tpu.memory_space<vmem>>, vector<32x1xf32>,
      %29 = arith.truncf %17 : vector<32x128xf32> to vector<32x128xbf16>
      %c0_25 = arith.constant 0 : index
      %c0_26 = arith.constant 0 : index
      %30 = vector.load %arg4[%c0_25, %c0_26] : memref<32x128xbf16, #tpu.memory_space<vmem>>, vector<32x128xbf16>
      tpu.vector_store %arg4[%c0_25, %c0_26], %29 {strides = array<i32>} : memref<32x128xbf16, #tpu.memory_space<vmem>>, vector<32x128xbf16>,
    } else {
    }
    return
  }
  func.func @transform_0(%arg0: i32, %arg1: i32) -> (i32, i32) {
    %c0_i32 = arith.constant 0 : i32
    %c0_i32_0 = arith.constant 0 : i32
    return %c0_i32, %arg1 : i32, i32
  }
  func.func @transform_1(%arg0: i32, %arg1: i32) -> (i32, i32) {
    %c0_i32 = arith.constant 0 : i32
    return %arg1, %arg0 : i32, i32
  }
  func.func @transform_2(%arg0: i32, %arg1: i32) -> (i32, i32) {
    %c0_i32 = arith.constant 0 : i32
    %c0_i32_0 = arith.constant 0 : i32
    return %c0_i32, %arg0 : i32, i32
  }
  func.func @transform_3(%arg0: i32, %arg1: i32) -> (i32, i32) {
    %c0_i32 = arith.constant 0 : i32
    %c0_i32_0 = arith.constant 0 : i32
    %c0_i32_1 = arith.constant 0 : i32
    return %c0_i32, %c0_i32_0 : i32, i32
  }
  func.func @transform_4(%arg0: i32, %arg1: i32) -> (i32, i32) {
    %c0_i32 = arith.constant 0 : i32
    %c0_i32_0 = arith.constant 0 : i32
    %c0_i32_1 = arith.constant 0 : i32
    return %c0_i32, %c0_i32_0 : i32, i32
  }
}

module attributes {stable_mosaic.version = 11 : i64} {
  func.func @_bn_lrelu_kernel(%arg0: i32, %arg1: memref<32x128xbf16, #tpu.memory_space<vmem>>, %arg2: memref<32x1xf32, #tpu.memory_space<vmem>>, %arg3: memref<32x1xf32, #tpu.memory_space<vmem>>, %arg4: memref<32x128xbf16, #tpu.memory_space<vmem>>) attributes {dimension_semantics = [#tpu.dimension_semantics<parallel>], iteration_bounds = array<i64: 1>, scalar_prefetch = 0 : i64, scratch_operands = 0 : i64, tpu.core_type = #tpu.core_type<tc>, window_params = [{transform_indices = @transform_0, window_bounds = array<i64: 32, 128>}, {pipeline_mode = #tpu.pipeline_mode<synchronous>, transform_indices = @transform_1, window_bounds = array<i64: 32, 1>}, {pipeline_mode = #tpu.pipeline_mode<synchronous>, transform_indices = @transform_2, window_bounds = array<i64: 32, 1>}, {transform_indices = @transform_3, window_bounds = array<i64: 32, 128>}]} {
    %c0 = arith.constant 0 : index
    %c0_0 = arith.constant 0 : index
    %0 = vector.load %arg1[%c0, %c0_0] : memref<32x128xbf16, #tpu.memory_space<vmem>>, vector<32x128xbf16>
    %1 = arith.extf %0 : vector<32x128xbf16> to vector<32x128xf32>
    %c0_1 = arith.constant 0 : index
    %c0_2 = arith.constant 0 : index
    %2 = vector.load %arg2[%c0_1, %c0_2] : memref<32x1xf32, #tpu.memory_space<vmem>>, vector<32x1xf32>
    %3 = vector.broadcast %2 : vector<32x1xf32> to vector<32x128xf32>
    %4 = arith.mulf %1, %3 : vector<32x128xf32>
    %c0_3 = arith.constant 0 : index
    %c0_4 = arith.constant 0 : index
    %5 = vector.load %arg3[%c0_3, %c0_4] : memref<32x1xf32, #tpu.memory_space<vmem>>, vector<32x1xf32>
    %6 = vector.broadcast %5 : vector<32x1xf32> to vector<32x128xf32>
    %7 = arith.addf %4, %6 : vector<32x128xf32>
    %cst = arith.constant 2.000000e-01 : f32
    %8 = vector.broadcast %cst : f32 to vector<32x128xf32>
    %9 = arith.mulf %8, %7 : vector<32x128xf32>
    %10 = arith.maximumf %7, %9 : vector<32x128xf32>
    %11 = arith.truncf %10 : vector<32x128xf32> to vector<32x128xbf16>
    %c0_5 = arith.constant 0 : index
    %c0_6 = arith.constant 0 : index
    %12 = vector.load %arg4[%c0_5, %c0_6] : memref<32x128xbf16, #tpu.memory_space<vmem>>, vector<32x128xbf16>
    tpu.vector_store %arg4[%c0_5, %c0_6], %11 {strides = array<i32>} : memref<32x128xbf16, #tpu.memory_space<vmem>>, vector<32x128xbf16>,
    return
  }
  func.func @transform_0(%arg0: i32) -> (i32, i32) {
    %c0_i32 = arith.constant 0 : i32
    %c0_i32_0 = arith.constant 0 : i32
    return %c0_i32, %arg0 : i32, i32
  }
  func.func @transform_1(%arg0: i32) -> (i32, i32) {
    %c0_i32 = arith.constant 0 : i32
    %c0_i32_0 = arith.constant 0 : i32
    %c0_i32_1 = arith.constant 0 : i32
    return %c0_i32, %c0_i32_0 : i32, i32
  }
  func.func @transform_2(%arg0: i32) -> (i32, i32) {
    %c0_i32 = arith.constant 0 : i32
    %c0_i32_0 = arith.constant 0 : i32
    %c0_i32_1 = arith.constant 0 : i32
    return %c0_i32, %c0_i32_0 : i32, i32
  }
  func.func @transform_3(%arg0: i32) -> (i32, i32) {
    %c0_i32 = arith.constant 0 : i32
    %c0_i32_0 = arith.constant 0 : i32
    return %c0_i32, %arg0 : i32, i32
  }
}

module attributes {stable_mosaic.version = 11 : i64} {
  func.func @_conv_kernel(%arg0: i32, %arg1: i32, %arg2: memref<64x512xbf16, #tpu.memory_space<vmem>>, %arg3: memref<512x32xbf16, #tpu.memory_space<vmem>>, %arg4: memref<64x32xbf16, #tpu.memory_space<vmem>>, %arg5: memref<64x1xf32, #tpu.memory_space<vmem>>, %arg6: memref<64x1xf32, #tpu.memory_space<vmem>>, %arg7: memref<64x32xf32, #tpu.memory_space<vmem>>) attributes {dimension_semantics = [#tpu.dimension_semantics<arbitrary>, #tpu.dimension_semantics<arbitrary>], iteration_bounds = array<i64: 1, 1>, scalar_prefetch = 0 : i64, scratch_operands = 1 : i64, tpu.core_type = #tpu.core_type<tc>, window_params = [{transform_indices = @transform_0, window_bounds = array<i64: 64, 512>}, {transform_indices = @transform_1, window_bounds = array<i64: 512, 32>}, {transform_indices = @transform_2, window_bounds = array<i64: 64, 32>}, {pipeline_mode = #tpu.pipeline_mode<synchronous>, transform_indices = @transform_3, window_bounds = array<i64: 64, 1>}, {pipeline_mode = #tpu.pipeline_mode<synchronous>, transform_indices = @transform_4, window_bounds = array<i64: 64, 1>}]} {
    %c0_i32 = arith.constant 0 : i32
    %0 = arith.cmpi eq, %arg1, %c0_i32 : i32
    %1 = arith.extui %0 : i1 to i32
    %c0_i32_0 = arith.constant 0 : i32
    %2 = arith.cmpi ne, %1, %c0_i32_0 : i32
    scf.if %2 {
      %cst_13 = arith.constant 0.000000e+00 : f32
      %17 = vector.broadcast %cst_13 : f32 to vector<64x32xf32>
      %c0_14 = arith.constant 0 : index
      %c0_15 = arith.constant 0 : index
      %18 = vector.load %arg7[%c0_14, %c0_15] : memref<64x32xf32, #tpu.memory_space<vmem>>, vector<64x32xf32>
      tpu.vector_store %arg7[%c0_14, %c0_15], %17 {strides = array<i32>} : memref<64x32xf32, #tpu.memory_space<vmem>>, vector<64x32xf32>,
    } else {
    }
    %c0_i32_1 = arith.constant 0 : i32
    %3 = arith.cmpi eq, %arg0, %c0_i32_1 : i32
    %c0_i32_2 = arith.constant 0 : i32
    %4 = arith.cmpi eq, %arg1, %c0_i32_2 : i32
    %5 = arith.andi %3, %4 : i1
    %6 = arith.extui %5 : i1 to i32
    %c0_i32_3 = arith.constant 0 : i32
    %7 = arith.cmpi ne, %6, %c0_i32_3 : i32
    scf.if %7 {
      %cst_13 = arith.constant 0.000000e+00 : f32
      %17 = vector.broadcast %cst_13 : f32 to vector<64x1xf32>
      %c0_14 = arith.constant 0 : index
      %c0_15 = arith.constant 0 : index
      %18 = vector.load %arg5[%c0_14, %c0_15] : memref<64x1xf32, #tpu.memory_space<vmem>>, vector<64x1xf32>
      tpu.vector_store %arg5[%c0_14, %c0_15], %17 {strides = array<i32>} : memref<64x1xf32, #tpu.memory_space<vmem>>, vector<64x1xf32>,
      %cst_16 = arith.constant 0.000000e+00 : f32
      %19 = vector.broadcast %cst_16 : f32 to vector<64x1xf32>
      %c0_17 = arith.constant 0 : index
      %c0_18 = arith.constant 0 : index
      %20 = vector.load %arg6[%c0_17, %c0_18] : memref<64x1xf32, #tpu.memory_space<vmem>>, vector<64x1xf32>
      tpu.vector_store %arg6[%c0_17, %c0_18], %19 {strides = array<i32>} : memref<64x1xf32, #tpu.memory_space<vmem>>, vector<64x1xf32>,
    } else {
    }
    %c0 = arith.constant 0 : index
    %c0_4 = arith.constant 0 : index
    %8 = vector.load %arg7[%c0, %c0_4] : memref<64x32xf32, #tpu.memory_space<vmem>>, vector<64x32xf32>
    %c0_5 = arith.constant 0 : index
    %c0_6 = arith.constant 0 : index
    %9 = vector.load %arg2[%c0_5, %c0_6] : memref<64x512xbf16, #tpu.memory_space<vmem>>, vector<64x512xbf16>
    %c0_7 = arith.constant 0 : index
    %c0_8 = arith.constant 0 : index
    %10 = vector.load %arg3[%c0_7, %c0_8] : memref<512x32xbf16, #tpu.memory_space<vmem>>, vector<512x32xbf16>
    %cst = arith.constant dense<0.000000e+00> : vector<64x32xf32>
    %11 = tpu.matmul %9, %10, %cst {dimension_numbers = #tpu.dot_dimension_numbers<[1], [0], [0], [1], [0, 0, 1, 1], [], []>} : vector<64x512xbf16>, vector<512x32xbf16>, vector<64x32xf32> -> vector<64x32xf32>
    %12 = arith.addf %8, %11 : vector<64x32xf32>
    %c0_9 = arith.constant 0 : index
    %c0_10 = arith.constant 0 : index
    %13 = vector.load %arg7[%c0_9, %c0_10] : memref<64x32xf32, #tpu.memory_space<vmem>>, vector<64x32xf32>
    tpu.vector_store %arg7[%c0_9, %c0_10], %12 {strides = array<i32>} : memref<64x32xf32, #tpu.memory_space<vmem>>, vector<64x32xf32>,
    %c0_i32_11 = arith.constant 0 : i32
    %14 = arith.cmpi eq, %arg1, %c0_i32_11 : i32
    %15 = arith.extui %14 : i1 to i32
    %c0_i32_12 = arith.constant 0 : i32
    %16 = arith.cmpi ne, %15, %c0_i32_12 : i32
    scf.if %16 {
      %c0_13 = arith.constant 0 : index
      %c0_14 = arith.constant 0 : index
      %17 = vector.load %arg7[%c0_13, %c0_14] : memref<64x32xf32, #tpu.memory_space<vmem>>, vector<64x32xf32>
      %c0_15 = arith.constant 0 : index
      %c0_16 = arith.constant 0 : index
      %18 = vector.load %arg5[%c0_15, %c0_16] : memref<64x1xf32, #tpu.memory_space<vmem>>, vector<64x1xf32>
      %cst_17 = arith.constant dense<0.000000e+00> : vector<64xf32>
      %19 = vector.multi_reduction <add>, %17, %cst_17 [1] : vector<64x32xf32> to vector<64xf32>
      %20 = vector.shape_cast %19 : vector<64xf32> to vector<64x1xf32>
      %21 = arith.addf %18, %20 : vector<64x1xf32>
      %c0_18 = arith.constant 0 : index
      %c0_19 = arith.constant 0 : index
      %22 = vector.load %arg5[%c0_18, %c0_19] : memref<64x1xf32, #tpu.memory_space<vmem>>, vector<64x1xf32>
      tpu.vector_store %arg5[%c0_18, %c0_19], %21 {strides = array<i32>} : memref<64x1xf32, #tpu.memory_space<vmem>>, vector<64x1xf32>,
      %c0_20 = arith.constant 0 : index
      %c0_21 = arith.constant 0 : index
      %23 = vector.load %arg6[%c0_20, %c0_21] : memref<64x1xf32, #tpu.memory_space<vmem>>, vector<64x1xf32>
      %24 = arith.mulf %17, %17 : vector<64x32xf32>
      %cst_22 = arith.constant dense<0.000000e+00> : vector<64xf32>
      %25 = vector.multi_reduction <add>, %24, %cst_22 [1] : vector<64x32xf32> to vector<64xf32>
      %26 = vector.shape_cast %25 : vector<64xf32> to vector<64x1xf32>
      %27 = arith.addf %23, %26 : vector<64x1xf32>
      %c0_23 = arith.constant 0 : index
      %c0_24 = arith.constant 0 : index
      %28 = vector.load %arg6[%c0_23, %c0_24] : memref<64x1xf32, #tpu.memory_space<vmem>>, vector<64x1xf32>
      tpu.vector_store %arg6[%c0_23, %c0_24], %27 {strides = array<i32>} : memref<64x1xf32, #tpu.memory_space<vmem>>, vector<64x1xf32>,
      %29 = arith.truncf %17 : vector<64x32xf32> to vector<64x32xbf16>
      %c0_25 = arith.constant 0 : index
      %c0_26 = arith.constant 0 : index
      %30 = vector.load %arg4[%c0_25, %c0_26] : memref<64x32xbf16, #tpu.memory_space<vmem>>, vector<64x32xbf16>
      tpu.vector_store %arg4[%c0_25, %c0_26], %29 {strides = array<i32>} : memref<64x32xbf16, #tpu.memory_space<vmem>>, vector<64x32xbf16>,
    } else {
    }
    return
  }
  func.func @transform_0(%arg0: i32, %arg1: i32) -> (i32, i32) {
    %c0_i32 = arith.constant 0 : i32
    %c0_i32_0 = arith.constant 0 : i32
    return %c0_i32, %arg1 : i32, i32
  }
  func.func @transform_1(%arg0: i32, %arg1: i32) -> (i32, i32) {
    %c0_i32 = arith.constant 0 : i32
    return %arg1, %arg0 : i32, i32
  }
  func.func @transform_2(%arg0: i32, %arg1: i32) -> (i32, i32) {
    %c0_i32 = arith.constant 0 : i32
    %c0_i32_0 = arith.constant 0 : i32
    return %c0_i32, %arg0 : i32, i32
  }
  func.func @transform_3(%arg0: i32, %arg1: i32) -> (i32, i32) {
    %c0_i32 = arith.constant 0 : i32
    %c0_i32_0 = arith.constant 0 : i32
    %c0_i32_1 = arith.constant 0 : i32
    return %c0_i32, %c0_i32_0 : i32, i32
  }
  func.func @transform_4(%arg0: i32, %arg1: i32) -> (i32, i32) {
    %c0_i32 = arith.constant 0 : i32
    %c0_i32_0 = arith.constant 0 : i32
    %c0_i32_1 = arith.constant 0 : i32
    return %c0_i32, %c0_i32_0 : i32, i32
  }
}

module attributes {stable_mosaic.version = 11 : i64} {
  func.func @_bn_lrelu_kernel(%arg0: i32, %arg1: memref<64x32xbf16, #tpu.memory_space<vmem>>, %arg2: memref<64x1xf32, #tpu.memory_space<vmem>>, %arg3: memref<64x1xf32, #tpu.memory_space<vmem>>, %arg4: memref<64x32xbf16, #tpu.memory_space<vmem>>) attributes {dimension_semantics = [#tpu.dimension_semantics<parallel>], iteration_bounds = array<i64: 1>, scalar_prefetch = 0 : i64, scratch_operands = 0 : i64, tpu.core_type = #tpu.core_type<tc>, window_params = [{transform_indices = @transform_0, window_bounds = array<i64: 64, 32>}, {pipeline_mode = #tpu.pipeline_mode<synchronous>, transform_indices = @transform_1, window_bounds = array<i64: 64, 1>}, {pipeline_mode = #tpu.pipeline_mode<synchronous>, transform_indices = @transform_2, window_bounds = array<i64: 64, 1>}, {transform_indices = @transform_3, window_bounds = array<i64: 64, 32>}]} {
    %c0 = arith.constant 0 : index
    %c0_0 = arith.constant 0 : index
    %0 = vector.load %arg1[%c0, %c0_0] : memref<64x32xbf16, #tpu.memory_space<vmem>>, vector<64x32xbf16>
    %1 = arith.extf %0 : vector<64x32xbf16> to vector<64x32xf32>
    %c0_1 = arith.constant 0 : index
    %c0_2 = arith.constant 0 : index
    %2 = vector.load %arg2[%c0_1, %c0_2] : memref<64x1xf32, #tpu.memory_space<vmem>>, vector<64x1xf32>
    %3 = vector.broadcast %2 : vector<64x1xf32> to vector<64x32xf32>
    %4 = arith.mulf %1, %3 : vector<64x32xf32>
    %c0_3 = arith.constant 0 : index
    %c0_4 = arith.constant 0 : index
    %5 = vector.load %arg3[%c0_3, %c0_4] : memref<64x1xf32, #tpu.memory_space<vmem>>, vector<64x1xf32>
    %6 = vector.broadcast %5 : vector<64x1xf32> to vector<64x32xf32>
    %7 = arith.addf %4, %6 : vector<64x32xf32>
    %cst = arith.constant 2.000000e-01 : f32
    %8 = vector.broadcast %cst : f32 to vector<64x32xf32>
    %9 = arith.mulf %8, %7 : vector<64x32xf32>
    %10 = arith.maximumf %7, %9 : vector<64x32xf32>
    %11 = arith.truncf %10 : vector<64x32xf32> to vector<64x32xbf16>
    %c0_5 = arith.constant 0 : index
    %c0_6 = arith.constant 0 : index
    %12 = vector.load %arg4[%c0_5, %c0_6] : memref<64x32xbf16, #tpu.memory_space<vmem>>, vector<64x32xbf16>
    tpu.vector_store %arg4[%c0_5, %c0_6], %11 {strides = array<i32>} : memref<64x32xbf16, #tpu.memory_space<vmem>>, vector<64x32xbf16>,
    return
  }
  func.func @transform_0(%arg0: i32) -> (i32, i32) {
    %c0_i32 = arith.constant 0 : i32
    %c0_i32_0 = arith.constant 0 : i32
    return %c0_i32, %arg0 : i32, i32
  }
  func.func @transform_1(%arg0: i32) -> (i32, i32) {
    %c0_i32 = arith.constant 0 : i32
    %c0_i32_0 = arith.constant 0 : i32
    %c0_i32_1 = arith.constant 0 : i32
    return %c0_i32, %c0_i32_0 : i32, i32
  }
  func.func @transform_2(%arg0: i32) -> (i32, i32) {
    %c0_i32 = arith.constant 0 : i32
    %c0_i32_0 = arith.constant 0 : i32
    %c0_i32_1 = arith.constant 0 : i32
    return %c0_i32, %c0_i32_0 : i32, i32
  }
  func.func @transform_3(%arg0: i32) -> (i32, i32) {
    %c0_i32 = arith.constant 0 : i32
    %c0_i32_0 = arith.constant 0 : i32
    return %c0_i32, %arg0 : i32, i32
  }
}

</mosaic_0001>

<bundles_post_ra>
// kernel: discriminator_forward.7
= control target key start
LH: loop header
LB: loop body
LE: loop exit
PB: predicated region body
PF: predicated region fallthrough
CT: control target
= control target key end

     0   :  { %v1039_v3 = vmov 0   ;;  %vm436_vm0 = vcmask 523264   ;;  %s1327_s1 = inlined_call_operand.vmem [shape: bf16[64,2048], index: 1, kind: input, shape index: {}]   ;;  %s1328_s0 = inlined_call_operand.vmem [shape: bf16[8,64], index: 0, kind: input, shape index: {}]   ;;  %s1329_s2 = inlined_call_operand.vmem [shape: f32[8,1], index: 2, kind: input, shape index: {}]   ;;  %s1330_s3 = inlined_call_operand.vmem [shape: bf16[8,2048], index: 3, kind: output, shape index: {}]  }
   0x1   :  { %v52_v0 = vld [vmem:[%s1327_s1] sm:$0xff]  ;;  %v53_v2 = vld [vmem:[%s1327_s1 + $0x8] sm:$0xff]  ;;  %472 = vmatprep.mubr.bf16.mxu0 %v1039_v3  ;;  %513 = vmatprep.mubr.bf16.mxu1 %v1039_v3  ;;  %v54_v31 = vld [vmem:[%s1327_s1 + $0x10] sm:$0xff] }
   0x2   :  { %v60_v1 = vld [vmem:[%s1327_s1 + $0x40] sm:$0xff]  ;;  %v61_v5 = vld [vmem:[%s1327_s1 + $0x48] sm:$0xff]  ;;  %1038 = vset.pattern.permute.xlu0 %v1039_v3  ;;  %v62_v32 = vld [vmem:[%s1327_s1 + $0x50] sm:$0xff] }
   0x3   :  { %v950_v4 = vcombine.high %v52_v0, %v60_v1  ;;  %v949_v6 = vcombine.low %v52_v0, %v60_v1  ;;  %v68_v7 = vld [vmem:[%s1327_s1 + $0x80] sm:$0xff]  ;;  %v952_v9 = vcombine.high %v53_v2, %v61_v5  ;;  %v951_v10 = vcombine.low %v53_v2, %v61_v5  ;;  %v69_v12 = vld [vmem:[%s1327_s1 + $0x88] sm:$0xff]  ;;  %v55_v33 = vld [vmem:[%s1327_s1 + $0x18] sm:$0xff] }
   0x4   :  { %v76_v8 = vld [vmem:[%s1327_s1 + $0xc0] sm:$0xff]  ;;  %v77_v13 = vld [vmem:[%s1327_s1 + $0xc8] sm:$0xff]  ;;  %v63_v34 = vld [vmem:[%s1327_s1 + $0x58] sm:$0xff]  ;;  %v954_v37 = vcombine.high %v54_v31, %v62_v32  ;;  %v953_v44 = vcombine.low %v54_v31, %v62_v32 }
   0x5   :  { %v966_v11 = vcombine.high %v68_v7, %v76_v8  ;;  %v84_v14 = vld [vmem:[%s1327_s1 + $0x100] sm:$0xff]  ;;  %440 = vmatprep.subr.bf16.mxu0 %v950_v4  ;;  %v968_v15 = vcombine.high %v69_v12, %v77_v13  ;;  %v85_v17 = vld [vmem:[%s1327_s1 + $0x108] sm:$0xff]  ;;  %481 = vmatprep.subr.bf16.mxu1 %v952_v9  ;;  %v965_v19 = vcombine.low %v68_v7, %v76_v8  ;;  %v70_v39 = vld [vmem:[%s1327_s1 + $0x90] sm:$0xff] }
   0x6   :  { %v92_v16 = vld [vmem:[%s1327_s1 + $0x140] sm:$0xff]  ;;  %v93_v18 = vld [vmem:[%s1327_s1 + $0x148] sm:$0xff]  ;;  %441 = vmatpush1.bf16.msra.mxu0 %v949_v6  ;;  %482 = vmatpush1.bf16.msra.mxu1 %v951_v10  ;;  %v967_v20 = vcombine.low %v69_v12, %v77_v13  ;;  %v956_v38 = vcombine.high %v55_v33, %v63_v34  ;;  %v78_v40 = vld [vmem:[%s1327_s1 + $0xd0] sm:$0xff]  ;;  %v955_v45 = vcombine.low %v55_v33, %v63_v34 }
   0x7   :  { %442 = vmatprep.subr.bf16.mxu0 %v966_v11  ;;  %v982_v21 = vcombine.high %v84_v14, %v92_v16  ;;  %483 = vmatprep.subr.bf16.mxu1 %v968_v15  ;;  %v984_v22 = vcombine.high %v85_v17, %v93_v18  ;;  %v100_v23 = vld [vmem:[%s1327_s1 + $0x180] sm:$0xff]  ;;  %v101_v25 = vld [vmem:[%s1327_s1 + $0x188] sm:$0xff]  ;;  %v981_v27 = vcombine.low %v84_v14, %v92_v16  ;;  %v71_v41 = vld [vmem:[%s1327_s1 + $0x98] sm:$0xff] }
   0x8   :  { %v108_v24 = vld [vmem:[%s1327_s1 + $0x1c0] sm:$0xff]  ;;  %v109_v26 = vld [vmem:[%s1327_s1 + $0x1c8] sm:$0xff]  ;;  %v983_v28 = vcombine.low %v85_v17, %v93_v18  ;;  %v79_v42 = vld [vmem:[%s1327_s1 + $0xd8] sm:$0xff]  ;;  %v970_v46 = vcombine.high %v70_v39, %v78_v40  ;;  %v969_v52 = vcombine.low %v70_v39, %v78_v40 }
   0x9   :  { %v998_v29 = vcombine.high %v100_v23, %v108_v24  ;;  %v1000_v30 = vcombine.high %v101_v25, %v109_v26  ;;  %v997_v35 = vcombine.low %v100_v23, %v108_v24  ;;  %v999_v36 = vcombine.low %v101_v25, %v109_v26  ;;  %v1138_v43 = vld [vmem:[%s1328_s0] sm:$0xf]  ;;  %v86_v48 = vld [vmem:[%s1327_s1 + $0x110] sm:$0xff]  ;;  %v87_v50 = vld [vmem:[%s1327_s1 + $0x118] sm:$0xff] }
   0xa   :  { %443 = vmatpush1.bf16.msra.mxu0 %v965_v19  ;;  %484 = vmatpush1.bf16.msra.mxu1 %v967_v20  ;;  %v972_v47 = vcombine.high %v71_v41, %v79_v42  ;;  %v94_v49 = vld [vmem:[%s1327_s1 + $0x150] sm:$0xff]  ;;  %v95_v51 = vld [vmem:[%s1327_s1 + $0x158] sm:$0xff]  ;;  %v971_v53 = vcombine.low %v71_v41, %v79_v42  ;;  %v819_v55 = vld [vmem:[%s1329_s2] sm:$0xff] }
   0xb   :  { %444 = vmatprep.subr.bf16.mxu0 %v982_v21  ;;  %485 = vmatprep.subr.bf16.mxu1 %v984_v22  ;;  %v986_v54 = vcombine.high %v86_v48, %v94_v49  ;;  %v988_v56 = vcombine.high %v87_v50, %v95_v51  ;;  %v102_v57 = vld [vmem:[%s1327_s1 + $0x190] sm:$0xff]  ;;  %v103_v59 = vld [vmem:[%s1327_s1 + $0x198] sm:$0xff]  ;;  %v985_v61 = vcombine.low %v86_v48, %v94_v49  ;;  %v56_v1 = vld [vmem:[%s1327_s1 + $0x20] sm:$0xff] }
   0xc   :  { %v110_v58 = vld [vmem:[%s1327_s1 + $0x1d0] sm:$0xff]  ;;  %v111_v60 = vld [vmem:[%s1327_s1 + $0x1d8] sm:$0xff]  ;;  %822 = vperm.xlu0 %1038, %v819_v55   ;;  %v987_v62 = vcombine.low %v87_v50, %v95_v51  ;;  %v64_v2 = vld [vmem:[%s1327_s1 + $0x60] sm:$0xff] }
   0xd   :  { %v1002_v63 = vcombine.high %v102_v57, %v110_v58  ;;  %v1004_v0 = vcombine.high %v103_v59, %v111_v60  ;;  %v57_v4 = vld [vmem:[%s1327_s1 + $0x28] sm:$0xff]  ;;  %v1001_v6 = vcombine.low %v102_v57, %v110_v58  ;;  %v1003_v7 = vcombine.low %v103_v59, %v111_v60  ;;  %v72_v10 = vld [vmem:[%s1327_s1 + $0xa0] sm:$0xff]  ;;  %v58_v34 = vld [vmem:[%s1327_s1 + $0x30] sm:$0xff] }
   0xe   :  { %445 = vmatpush1.bf16.msra.mxu0 %v981_v27  ;;  %486 = vmatpush1.bf16.msra.mxu1 %v983_v28  ;;  %v65_v5 = vld [vmem:[%s1327_s1 + $0x68] sm:$0xff]  ;;  %v958_v8 = vcombine.high %v56_v1, %v64_v2  ;;  %v80_v11 = vld [vmem:[%s1327_s1 + $0xe0] sm:$0xff]  ;;  %v957_v14 = vcombine.low %v56_v1, %v64_v2  ;;  %v74_v42 = vld [vmem:[%s1327_s1 + $0xb0] sm:$0xff] }
   0xf   :  { %446 = vmatprep.subr.bf16.mxu0 %v998_v29  ;;  %487 = vmatprep.subr.bf16.mxu1 %v1000_v30  ;;  %v960_v9 = vcombine.high %v57_v4, %v65_v5  ;;  %v73_v12 = vld [vmem:[%s1327_s1 + $0xa8] sm:$0xff]  ;;  %v959_v15 = vcombine.low %v57_v4, %v65_v5  ;;  %v974_v16 = vcombine.high %v72_v10, %v80_v11  ;;  %v88_v18 = vld [vmem:[%s1327_s1 + $0x120] sm:$0xff]  ;;  %v90_v51 = vld [vmem:[%s1327_s1 + $0x130] sm:$0xff] }
  0x10   :  { %v81_v13 = vld [vmem:[%s1327_s1 + $0xe8] sm:$0xff]  ;;  %v96_v19 = vld [vmem:[%s1327_s1 + $0x160] sm:$0xff]  ;;  %v973_v22 = vcombine.low %v72_v10, %v80_v11  ;;  %v106_v59 = vld [vmem:[%s1327_s1 + $0x1b0] sm:$0xff] }
  0x11   :  { %v976_v17 = vcombine.high %v73_v12, %v81_v13  ;;  %v89_v20 = vld [vmem:[%s1327_s1 + $0x128] sm:$0xff]  ;;  %v975_v23 = vcombine.low %v73_v12, %v81_v13  ;;  %v990_v24 = vcombine.high %v88_v18, %v96_v19  ;;  %v104_v26 = vld [vmem:[%s1327_s1 + $0x1a0] sm:$0xff]  ;;  %v989_v30 = vcombine.low %v88_v18, %v96_v19  ;;  %v114_v60 = vld [vmem:[%s1327_s1 + $0x1f0] sm:$0xff] }
  0x12   :  { %447 = vmatpush1.bf16.msra.mxu0 %v997_v35  ;;  %488 = vmatpush1.bf16.msra.mxu1 %v999_v36  ;;  %v97_v21 = vld [vmem:[%s1327_s1 + $0x168] sm:$0xff]  ;;  %v112_v27 = vld [vmem:[%s1327_s1 + $0x1e0] sm:$0xff]  ;;  %v66_v35 = vld [vmem:[%s1327_s1 + $0x70] sm:$0xff]  ;;  %v1010_v1 = vcombine.high %v106_v59, %v114_v60  ;;  %v1009_v4 = vcombine.low %v106_v59, %v114_v60 }
  0x13   :  { %522 = vmatprep.subr.bf16.mxu0 %v954_v37  ;;  %563 = vmatprep.subr.bf16.mxu1 %v956_v38  ;;  %v992_v25 = vcombine.high %v89_v20, %v97_v21  ;;  %v105_v28 = vld [vmem:[%s1327_s1 + $0x1a8] sm:$0xff]  ;;  %v991_v31 = vcombine.low %v89_v20, %v97_v21  ;;  %v1006_v32 = vcombine.high %v104_v26, %v112_v27  ;;  %v59_v36 = vld [vmem:[%s1327_s1 + $0x38] sm:$0xff] }
  0x14   :  { %v113_v29 = vld [vmem:[%s1327_s1 + $0x1e8] sm:$0xff]  ;;  %v67_v37 = vld [vmem:[%s1327_s1 + $0x78] sm:$0xff]  ;;  %v1005_v38 = vcombine.low %v104_v26, %v112_v27  ;;  %v962_v40 = vcombine.high %v58_v34, %v66_v35 }
  0x15   :  { %1013 = vmatmul.mubr.msk.bf16.vlgmr.msra.gmra.mrb[0].mxu0 %vm436_vm0, %v1138_v43  ;;  %1014 = vmatmul.mubr.msk.bf16.vlgmr.msra.gmra.mrb[0].mxu1 %vm436_vm0, %v1138_v43  ;;  %v1008_v33 = vcombine.high %v105_v28, %v113_v29  ;;  %v1007_v39 = vcombine.low %v105_v28, %v113_v29  ;;  %v964_v41 = vcombine.high %v59_v36, %v67_v37 }
  0x16   :  { %523 = vmatpush1.bf16.msra.mxu0 %v953_v44  ;;  %564 = vmatpush1.bf16.msra.mxu1 %v955_v45  ;;  %v82_v44 = vld [vmem:[%s1327_s1 + $0xf0] sm:$0xff]  ;;  %v75_v45 = vld [vmem:[%s1327_s1 + $0xb8] sm:$0xff]  ;;  %v963_v48 = vcombine.low %v59_v36, %v67_v37 }
  0x17   :  { %524 = vmatprep.subr.bf16.mxu0 %v970_v46  ;;  %565 = vmatprep.subr.bf16.mxu1 %v972_v47  ;;  %v83_v46 = vld [vmem:[%s1327_s1 + $0xf8] sm:$0xff]  ;;  %v961_v47 = vcombine.low %v58_v34, %v66_v35  ;;  %v978_v49 = vcombine.high %v74_v42, %v82_v44  ;;  %v977_v55 = vcombine.low %v74_v42, %v82_v44 }
  0x18   :  { %554 = vmatprep.mubr.bf16.mxu0 %v1039_v3  ;;  %595 = vmatprep.mubr.bf16.mxu1 %v1039_v3  ;;  %v980_v50 = vcombine.high %v75_v45, %v83_v46 }
  0x1a   :  { %525 = vmatpush1.bf16.msra.mxu0 %v969_v52  ;;  %566 = vmatpush1.bf16.msra.mxu1 %v971_v53  ;;  %v98_v52 = vld [vmem:[%s1327_s1 + $0x170] sm:$0xff]  ;;  %v91_v53 = vld [vmem:[%s1327_s1 + $0x138] sm:$0xff] }
  0x1b   :  { %526 = vmatprep.subr.bf16.mxu0 %v986_v54  ;;  %567 = vmatprep.subr.bf16.mxu1 %v988_v56  ;;  %v99_v54 = vld [vmem:[%s1327_s1 + $0x178] sm:$0xff]  ;;  %v979_v56 = vcombine.low %v75_v45, %v83_v46  ;;  %v994_v57 = vcombine.high %v90_v51, %v98_v52 }
  0x1c   :  { %v996_v58 = vcombine.high %v91_v53, %v99_v54 }
  0x1e   :  { %527 = vmatpush1.bf16.msra.mxu0 %v985_v61  ;;  %568 = vmatpush1.bf16.msra.mxu1 %v987_v62  ;;  %v107_v61 = vld [vmem:[%s1327_s1 + $0x1b8] sm:$0xff] }
  0x1f   :  { %528 = vmatprep.subr.bf16.mxu0 %v1002_v63  ;;  %569 = vmatprep.subr.bf16.mxu1 %v1004_v0  ;;  %v115_v62 = vld [vmem:[%s1327_s1 + $0x1f8] sm:$0xff]  ;;  %v993_v63 = vcombine.low %v90_v51, %v98_v52  ;;  %v995_v0 = vcombine.low %v91_v53, %v99_v54 }
  0x20   :  { %v1012_v2 = vcombine.high %v107_v61, %v115_v62  ;;  %v1011_v5 = vcombine.low %v107_v61, %v115_v62 }
  0x22   :  { %529 = vmatpush1.bf16.msra.mxu0 %v1001_v6  ;;  %570 = vmatpush1.bf16.msra.mxu1 %v1003_v7 }
  0x23   :  { %604 = vmatprep.subr.bf16.mxu0 %v958_v8  ;;  %645 = vmatprep.subr.bf16.mxu1 %v960_v9 }
  0x25   :  { %1015 = vmatmul.mubr.msk.bf16.vlgmr.msra.gmra.mrb[4].mxu0 %vm436_vm0, %v1138_v43  ;;  %1016 = vmatmul.mubr.msk.bf16.vlgmr.msra.gmra.mrb[4].mxu1 %vm436_vm0, %v1138_v43 }
  0x26   :  { %605 = vmatpush1.bf16.msra.mxu0 %v957_v14  ;;  %646 = vmatpush1.bf16.msra.mxu1 %v959_v15 }
  0x27   :  { %606 = vmatprep.subr.bf16.mxu0 %v974_v16  ;;  %647 = vmatprep.subr.bf16.mxu1 %v976_v17 }
  0x28   :  { %636 = vmatprep.mubr.bf16.mxu0 %v1039_v3  ;;  %677 = vmatprep.mubr.bf16.mxu1 %v1039_v3 }
  0x2a   :  { %607 = vmatpush1.bf16.msra.mxu0 %v973_v22  ;;  %648 = vmatpush1.bf16.msra.mxu1 %v975_v23 }
  0x2b   :  { %608 = vmatprep.subr.bf16.mxu0 %v990_v24  ;;  %649 = vmatprep.subr.bf16.mxu1 %v992_v25 }
  0x2e   :  { %609 = vmatpush1.bf16.msra.mxu0 %v989_v30  ;;  %650 = vmatpush1.bf16.msra.mxu1 %v991_v31 }
  0x2f   :  { %610 = vmatprep.subr.bf16.mxu0 %v1006_v32  ;;  %651 = vmatprep.subr.bf16.mxu1 %v1008_v33 }
  0x32   :  { %611 = vmatpush1.bf16.msra.mxu0 %v1005_v38  ;;  %652 = vmatpush1.bf16.msra.mxu1 %v1007_v39 }
  0x33   :  { %686 = vmatprep.subr.bf16.mxu0 %v962_v40  ;;  %727 = vmatprep.subr.bf16.mxu1 %v964_v41 }
  0x35   :  { %1017 = vmatmul.mubr.msk.bf16.vlgmr.msra.gmra.mrb[8].mxu0 %vm436_vm0, %v1138_v43  ;;  %1018 = vmatmul.mubr.msk.bf16.vlgmr.msra.gmra.mrb[8].mxu1 %vm436_vm0, %v1138_v43 }
  0x36   :  { %687 = vmatpush1.bf16.msra.mxu0 %v961_v47  ;;  %728 = vmatpush1.bf16.msra.mxu1 %v963_v48 }
  0x37   :  { %688 = vmatprep.subr.bf16.mxu0 %v978_v49  ;;  %729 = vmatprep.subr.bf16.mxu1 %v980_v50 }
  0x38   :  { %718 = vmatprep.mubr.bf16.mxu0 %v1039_v3  ;;  %759 = vmatprep.mubr.bf16.mxu1 %v1039_v3 }
  0x3a   :  { %689 = vmatpush1.bf16.msra.mxu0 %v977_v55  ;;  %730 = vmatpush1.bf16.msra.mxu1 %v979_v56 }
  0x3b   :  { %690 = vmatprep.subr.bf16.mxu0 %v994_v57  ;;  %731 = vmatprep.subr.bf16.mxu1 %v996_v58 }
  0x3e   :  { %691 = vmatpush1.bf16.msra.mxu0 %v993_v63  ;;  %732 = vmatpush1.bf16.msra.mxu1 %v995_v0 }
  0x3f   :  { %692 = vmatprep.subr.bf16.mxu0 %v1010_v1  ;;  %733 = vmatprep.subr.bf16.mxu1 %v1012_v2 }
  0x42   :  { %693 = vmatpush1.bf16.msra.mxu0 %v1009_v4  ;;  %734 = vmatpush1.bf16.msra.mxu1 %v1011_v5 }
  0x45   :  { %1019 = vmatmul.mubr.msk.bf16.vlgmr.msra.gmra.mrb[12].mxu0 %vm436_vm0, %v1138_v43  ;;  %1020 = vmatmul.mubr.msk.bf16.vlgmr.msra.gmra.mrb[12].mxu1 %vm436_vm0, %v1138_v43 }
  0x8b   :  { %v1285_v3 = vpop.permute.xlu0 %822 }
  0xe8   :  { %v474_v6 = vpop.f32.mrb[0].mxu0  ;;  %v515_v8 = vpop.f32.mrb[0].mxu1 }
  0xe9   :  { %v825_v7 = vadd.f32 %v1285_v3, %v474_v6  ;;  %v476_v9 = vpop.f32.mrb[1].mxu0  ;;  %v827_v10 = vadd.f32 %v1285_v3, %v515_v8  ;;  %v517_v12 = vpop.f32.mrb[1].mxu1 }
  0xea   :  { %v826_v11 = vadd.f32 %v1285_v3, %v476_v9  ;;  %v478_v13 = vpop.f32.mrb[2].mxu0  ;;  %v828_v15 = vadd.f32 %v1285_v3, %v517_v12  ;;  %v519_v16 = vpop.f32.mrb[2].mxu1 }
  0xeb   :  { %v841_v14 = vmul.f32 0.2, %v825_v7  ;;  %v479_v17 = vpop.f32.mrb[3].mxu0  ;;  %v843_v18 = vmul.f32 0.2, %v827_v10  ;;  %v520_v19 = vpop.f32.mrb[3].mxu1 }
  0xec   :  { %v842_v43 = vmul.f32 0.2, %v826_v11  ;;  %v844_v21 = vmul.f32 0.2, %v828_v15 }
  0xed   :  { %v857_v20 = vmax.f32 %v825_v7, %v841_v14  ;;  %v859_v22 = vmax.f32 %v827_v10, %v843_v18 }
  0xee   :  { %v858_v23 = vmax.f32 %v826_v11, %v842_v43  ;;  %v860_v24 = vmax.f32 %v828_v15, %v844_v21 }
  0xf0   :  { %v1029_v25 = vpack.c.bf16 %v858_v23, %v857_v20  ;;  %v1030_v26 = vpack.c.bf16 %v860_v24, %v859_v22 }
  0xf2   :  { %937 = vst [vmem:[%s1330_s3] sm:$0xff] %v1029_v25  ;;  %938 = vst [vmem:[%s1330_s3 + $0x8] sm:$0xff] %v1030_v26 }
  0xf8   :  { %v556_v27 = vpop.f32.mrb[4].mxu0  ;;  %v597_v29 = vpop.f32.mrb[4].mxu1 }
  0xf9   :  { %v829_v28 = vadd.f32 %v1285_v3, %v556_v27  ;;  %v558_v30 = vpop.f32.mrb[5].mxu0  ;;  %v831_v31 = vadd.f32 %v1285_v3, %v597_v29  ;;  %v599_v33 = vpop.f32.mrb[5].mxu1 }
  0xfa   :  { %v830_v32 = vadd.f32 %v1285_v3, %v558_v30  ;;  %v560_v34 = vpop.f32.mrb[6].mxu0  ;;  %v832_v36 = vadd.f32 %v1285_v3, %v599_v33  ;;  %v601_v37 = vpop.f32.mrb[6].mxu1 }
  0xfb   :  { %v845_v35 = vmul.f32 0.2, %v829_v28  ;;  %v561_v38 = vpop.f32.mrb[7].mxu0  ;;  %v847_v39 = vmul.f32 0.2, %v831_v31  ;;  %v602_v41 = vpop.f32.mrb[7].mxu1 }
  0xfc   :  { %v846_v40 = vmul.f32 0.2, %v830_v32  ;;  %v848_v44 = vmul.f32 0.2, %v832_v36 }
  0xfd   :  { %v861_v42 = vmax.f32 %v829_v28, %v845_v35  ;;  %v863_v45 = vmax.f32 %v831_v31, %v847_v39 }
  0xfe   :  { %v862_v46 = vmax.f32 %v830_v32, %v846_v40  ;;  %v864_v47 = vmax.f32 %v832_v36, %v848_v44 }
 0x100   :  { %v1031_v48 = vpack.c.bf16 %v862_v46, %v861_v42  ;;  %v1032_v49 = vpack.c.bf16 %v864_v47, %v863_v45 }
 0x102   :  { %939 = vst [vmem:[%s1330_s3 + $0x10] sm:$0xff] %v1031_v48  ;;  %940 = vst [vmem:[%s1330_s3 + $0x18] sm:$0xff] %v1032_v49 }
 0x108   :  { %v638_v50 = vpop.f32.mrb[8].mxu0  ;;  %v679_v52 = vpop.f32.mrb[8].mxu1 }
 0x109   :  { %v833_v51 = vadd.f32 %v1285_v3, %v638_v50  ;;  %v640_v53 = vpop.f32.mrb[9].mxu0  ;;  %v835_v54 = vadd.f32 %v1285_v3, %v679_v52  ;;  %v681_v56 = vpop.f32.mrb[9].mxu1 }
 0x10a   :  { %v834_v55 = vadd.f32 %v1285_v3, %v640_v53  ;;  %v642_v57 = vpop.f32.mrb[10].mxu0  ;;  %v836_v59 = vadd.f32 %v1285_v3, %v681_v56  ;;  %v683_v60 = vpop.f32.mrb[10].mxu1 }
 0x10b   :  { %v849_v58 = vmul.f32 0.2, %v833_v51  ;;  %v643_v61 = vpop.f32.mrb[11].mxu0  ;;  %v851_v62 = vmul.f32 0.2, %v835_v54  ;;  %v684_v0 = vpop.f32.mrb[11].mxu1 }
 0x10c   :  { %v850_v63 = vmul.f32 0.2, %v834_v55  ;;  %v852_v2 = vmul.f32 0.2, %v836_v59 }
 0x10d   :  { %v865_v1 = vmax.f32 %v833_v51, %v849_v58  ;;  %v867_v4 = vmax.f32 %v835_v54, %v851_v62 }
 0x10e   :  { %v866_v5 = vmax.f32 %v834_v55, %v850_v63  ;;  %v868_v6 = vmax.f32 %v836_v59, %v852_v2 }
 0x110   :  { %v1033_v7 = vpack.c.bf16 %v866_v5, %v865_v1  ;;  %v1034_v8 = vpack.c.bf16 %v868_v6, %v867_v4 }
 0x112   :  { %941 = vst [vmem:[%s1330_s3 + $0x20] sm:$0xff] %v1033_v7  ;;  %942 = vst [vmem:[%s1330_s3 + $0x28] sm:$0xff] %v1034_v8 }
 0x118   :  { %v720_v9 = vpop.f32.mrb[12].mxu0  ;;  %v761_v11 = vpop.f32.mrb[12].mxu1 }
 0x119   :  { %v837_v10 = vadd.f32 %v1285_v3, %v720_v9  ;;  %v722_v12 = vpop.f32.mrb[13].mxu0  ;;  %v839_v13 = vadd.f32 %v1285_v3, %v761_v11  ;;  %v763_v15 = vpop.f32.mrb[13].mxu1 }
 0x11a   :  { %v838_v14 = vadd.f32 %v1285_v3, %v722_v12  ;;  %v724_v16 = vpop.f32.mrb[14].mxu0  ;;  %v840_v18 = vadd.f32 %v1285_v3, %v763_v15  ;;  %v765_v43 = vpop.f32.mrb[14].mxu1 }
 0x11b   :  { %v853_v17 = vmul.f32 0.2, %v837_v10  ;;  %v725_v19 = vpop.f32.mrb[15].mxu0  ;;  %v855_v20 = vmul.f32 0.2, %v839_v13  ;;  %v766_v22 = vpop.f32.mrb[15].mxu1 }
 0x11c   :  { %v854_v21 = vmul.f32 0.2, %v838_v14  ;;  %v856_v24 = vmul.f32 0.2, %v840_v18 }
 0x11d   :  { %v869_v23 = vmax.f32 %v837_v10, %v853_v17  ;;  %v871_v25 = vmax.f32 %v839_v13, %v855_v20 }
 0x11e   :  { %v870_v26 = vmax.f32 %v838_v14, %v854_v21  ;;  %v872_v27 = vmax.f32 %v840_v18, %v856_v24 }
 0x120   :  { %v1035_v28 = vpack.c.bf16 %v870_v26, %v869_v23  ;;  %v1036_v29 = vpack.c.bf16 %v872_v27, %v871_v25 }
 0x122   :  { %943 = vst [vmem:[%s1330_s3 + $0x30] sm:$0xff] %v1035_v28  ;;  %944 = vst [vmem:[%s1330_s3 + $0x38] sm:$0xff] %v1036_v29 }

// kernel: discriminator_forward.8
= control target key start
LH: loop header
LB: loop body
LE: loop exit
PB: predicated region body
PF: predicated region fallthrough
CT: control target
= control target key end

     0   :  { %v531_v1 = vmov 0   ;;  %vm32_vm0 = vcmask 7168   ;;  %v532_v34 = vmov 0.0   ;;  %s713_s1 = inlined_call_operand.vmem [shape: bf16[128,512], index: 1, kind: input, shape index: {}]   ;;  %s714_s0 = inlined_call_operand.vmem [shape: bf16[16,128], index: 0, kind: input, shape index: {}]   ;;  %s715_s3 = inlined_call_operand.vmem [shape: f32[16,1], index: 3, kind: output, shape index: {1}]   ;;  %s716_s2 = inlined_call_operand.vmem [shape: bf16[16,512], index: 2, kind: output, shape index: {0}]   ;;  %s717_s4 = inlined_call_operand.vmem [shape: f32[16,1], index: 4, kind: output, shape index: {2}]  }
   0x1   :  { %v482_v0 = vld [vmem:[%s713_s1 + $0x4] ss:$16 sps:$4 sm:$0xff]   ;;  %277 = vmatprep.mubr.bf16.mxu0 %v531_v1  ;;  %320 = vmatprep.mubr.bf16.mxu1 %v531_v1  ;;  %v484_v2 = vld [vmem:[%s713_s1 + $0xc] ss:$16 sps:$4 sm:$0xff]   ;;  %v486_v3 = vld [vmem:[%s713_s1] ss:$16 sps:$4 sm:$0xff]  }
   0x2   :  { %245 = vmatprep.subr.bf16.mxu0 %v482_v0  ;;  %v487_v4 = vld [vmem:[%s713_s1 + $0x8] ss:$16 sps:$4 sm:$0xff]   ;;  %288 = vmatprep.subr.bf16.mxu1 %v484_v2  ;;  %v488_v5 = vld [vmem:[%s713_s1 + $0x24] ss:$16 sps:$4 sm:$0xff]   ;;  %v490_v6 = vld [vmem:[%s713_s1 + $0x2c] ss:$16 sps:$4 sm:$0xff]  }
   0x3   :  { %246 = vmatpush1.bf16.msra.mxu0 %v486_v3  ;;  %289 = vmatpush1.bf16.msra.mxu1 %v487_v4  ;;  %v492_v7 = vld [vmem:[%s713_s1 + $0x20] ss:$16 sps:$4 sm:$0xff]   ;;  %v493_v8 = vld [vmem:[%s713_s1 + $0x28] ss:$16 sps:$4 sm:$0xff]   ;;  %v494_v9 = vld [vmem:[%s713_s1 + $0x44] ss:$16 sps:$4 sm:$0xff]  }
   0x4   :  { %247 = vmatprep.subr.bf16.mxu0 %v488_v5  ;;  %290 = vmatprep.subr.bf16.mxu1 %v490_v6  ;;  %v496_v10 = vld [vmem:[%s713_s1 + $0x4c] ss:$16 sps:$4 sm:$0xff]   ;;  %v498_v11 = vld [vmem:[%s713_s1 + $0x40] ss:$16 sps:$4 sm:$0xff]   ;;  %v499_v12 = vld [vmem:[%s713_s1 + $0x48] ss:$16 sps:$4 sm:$0xff]  }
   0x5   :  { %v500_v13 = vld [vmem:[%s713_s1 + $0x64] ss:$16 sps:$4 sm:$0xff]   ;;  %v502_v14 = vld [vmem:[%s713_s1 + $0x6c] ss:$16 sps:$4 sm:$0xff]   ;;  %v504_v15 = vld [vmem:[%s713_s1 + $0x60] ss:$16 sps:$4 sm:$0xff]  }
   0x6   :  { %v505_v16 = vld [vmem:[%s713_s1 + $0x68] ss:$16 sps:$4 sm:$0xff]   ;;  %v506_v17 = vld [vmem:[%s713_s1 + $0x84] ss:$16 sps:$4 sm:$0xff]   ;;  %v508_v18 = vld [vmem:[%s713_s1 + $0x8c] ss:$16 sps:$4 sm:$0xff]  }
   0x7   :  { %248 = vmatpush1.bf16.msra.mxu0 %v492_v7  ;;  %291 = vmatpush1.bf16.msra.mxu1 %v493_v8  ;;  %v510_v19 = vld [vmem:[%s713_s1 + $0x80] ss:$16 sps:$4 sm:$0xff]   ;;  %v511_v20 = vld [vmem:[%s713_s1 + $0x88] ss:$16 sps:$4 sm:$0xff]   ;;  %v512_v21 = vld [vmem:[%s713_s1 + $0xa4] ss:$16 sps:$4 sm:$0xff]  }
   0x8   :  { %249 = vmatprep.subr.bf16.mxu0 %v494_v9  ;;  %292 = vmatprep.subr.bf16.mxu1 %v496_v10  ;;  %v514_v22 = vld [vmem:[%s713_s1 + $0xac] ss:$16 sps:$4 sm:$0xff]   ;;  %v516_v23 = vld [vmem:[%s713_s1 + $0xa0] ss:$16 sps:$4 sm:$0xff]   ;;  %v517_v24 = vld [vmem:[%s713_s1 + $0xa8] ss:$16 sps:$4 sm:$0xff]  }
   0x9   :  { %v518_v25 = vld [vmem:[%s713_s1 + $0xc4] ss:$16 sps:$4 sm:$0xff]   ;;  %v520_v26 = vld [vmem:[%s713_s1 + $0xcc] ss:$16 sps:$4 sm:$0xff]   ;;  %v522_v27 = vld [vmem:[%s713_s1 + $0xc0] ss:$16 sps:$4 sm:$0xff]  }
   0xa   :  { %v523_v28 = vld [vmem:[%s713_s1 + $0xc8] ss:$16 sps:$4 sm:$0xff]   ;;  %v524_v29 = vld [vmem:[%s713_s1 + $0xe4] ss:$16 sps:$4 sm:$0xff]   ;;  %v526_v30 = vld [vmem:[%s713_s1 + $0xec] ss:$16 sps:$4 sm:$0xff]  }
   0xb   :  { %250 = vmatpush1.bf16.msra.mxu0 %v498_v11  ;;  %293 = vmatpush1.bf16.msra.mxu1 %v499_v12  ;;  %v528_v31 = vld [vmem:[%s713_s1 + $0xe0] ss:$16 sps:$4 sm:$0xff]   ;;  %v529_v32 = vld [vmem:[%s713_s1 + $0xe8] ss:$16 sps:$4 sm:$0xff]   ;;  %33 = vst.msk [vmem:[%s715_s3] sm:$0xff] %vm32_vm0, %v532_v34  ;;  %34 = vst.msk [vmem:[%s715_s3 + $0x8] sm:$0xff] %vm32_vm0, %v532_v34 }
   0xc   :  { %251 = vmatprep.subr.bf16.mxu0 %v500_v13  ;;  %294 = vmatprep.subr.bf16.mxu1 %v502_v14  ;;  %v530_v33 = vld [vmem:[%s714_s0] sm:$0xff]   ;;  %35 = vst.msk [vmem:[%s717_s4] sm:$0xff] %vm32_vm0, %v532_v34  ;;  %36 = vst.msk [vmem:[%s717_s4 + $0x8] sm:$0xff] %vm32_vm0, %v532_v34 }
   0xf   :  { %252 = vmatpush1.bf16.msra.mxu0 %v504_v15  ;;  %295 = vmatpush1.bf16.msra.mxu1 %v505_v16 }
  0x10   :  { %253 = vmatprep.subr.bf16.mxu0 %v506_v17  ;;  %296 = vmatprep.subr.bf16.mxu1 %v508_v18 }
  0x12   :  { %v358_v3 = vld [vmem:[%s715_s3] sm:$0xff]  ;;  %v359_v8 = vld [vmem:[%s715_s3 + $0x8] sm:$0xff] }
  0x13   :  { %254 = vmatpush1.bf16.msra.mxu0 %v510_v19  ;;  %297 = vmatpush1.bf16.msra.mxu1 %v511_v20  ;;  %v375_v5 = vld [vmem:[%s717_s4] sm:$0xff]  ;;  %v376_v11 = vld [vmem:[%s717_s4 + $0x8] sm:$0xff] }
  0x14   :  { %255 = vmatprep.subr.bf16.mxu0 %v512_v21  ;;  %298 = vmatprep.subr.bf16.mxu1 %v514_v22 }
  0x17   :  { %256 = vmatpush1.bf16.msra.mxu0 %v516_v23  ;;  %299 = vmatpush1.bf16.msra.mxu1 %v517_v24 }
  0x18   :  { %257 = vmatprep.subr.bf16.mxu0 %v518_v25  ;;  %300 = vmatprep.subr.bf16.mxu1 %v520_v26 }
  0x1b   :  { %258 = vmatpush1.bf16.msra.mxu0 %v522_v27  ;;  %301 = vmatpush1.bf16.msra.mxu1 %v523_v28 }
  0x1c   :  { %259 = vmatprep.subr.bf16.mxu0 %v524_v29  ;;  %302 = vmatprep.subr.bf16.mxu1 %v526_v30 }
  0x1f   :  { %260 = vmatpush1.bf16.msra.mxu0 %v528_v31  ;;  %303 = vmatpush1.bf16.msra.mxu1 %v529_v32 }
  0x22   :  { %278 = vmatmul.mubr.bf16.vlgmr.msra.gmra.mrb[0].mxu0 %v530_v33  ;;  %321 = vmatmul.mubr.bf16.vlgmr.msra.gmra.mrb[0].mxu1 %v530_v33 }
  0xf5   :  { %v279_v35 = vpop.f32.mrb[0].mxu0  ;;  %v322_v36 = vpop.f32.mrb[0].mxu1 }
  0xf6   :  { %v377_v37 = vmul.f32 %v279_v35, %v279_v35  ;;  %v281_v38 = vpop.f32.mrb[1].mxu0  ;;  %v324_v39 = vpop.f32.mrb[1].mxu1  ;;  %v379_v46 = vmul.f32 %v322_v36, %v322_v36 }
  0xf7   :  { %v360_v40 = vadd.f32 %v281_v38, %v279_v35  ;;  %v378_v41 = vmul.f32 %v281_v38, %v281_v38  ;;  %v476_v42 = vpack.c.bf16 %v281_v38, %v279_v35  ;;  %v477_v43 = vpack.c.bf16 %v324_v39, %v322_v36  ;;  %v283_v44 = vpop.f32.mrb[2].mxu0  ;;  %v326_v45 = vpop.f32.mrb[2].mxu1 }
  0xf8   :  { %v381_v47 = vmul.f32 %v283_v44, %v283_v44  ;;  %v285_v48 = vpop.f32.mrb[3].mxu0  ;;  %v328_v49 = vpop.f32.mrb[3].mxu1  ;;  %v383_v56 = vmul.f32 %v326_v45, %v326_v45  ;;  %v380_v60 = vmul.f32 %v324_v39, %v324_v39 }
  0xf9   :  { %423 = vst [vmem:[%s716_s2] sm:$0xff] %v476_v42  ;;  %424 = vst [vmem:[%s716_s2 + $0x8] sm:$0xff] %v477_v43  ;;  %v365_v50 = vadd.f32 %v285_v48, %v283_v44  ;;  %v382_v51 = vmul.f32 %v285_v48, %v285_v48  ;;  %v478_v52 = vpack.c.bf16 %v285_v48, %v283_v44 }
  0xfa   :  { %v479_v53 = vpack.c.bf16 %v328_v49, %v326_v45  ;;  %v361_v54 = vadd.f32 %v360_v40, %v322_v36  ;;  %v385_v55 = vadd.f32 %v378_v41, %v377_v37  ;;  %v384_v62 = vmul.f32 %v328_v49, %v328_v49 }
  0xfb   :  { %v390_v57 = vadd.f32 %v382_v51, %v381_v47  ;;  %425 = vst [vmem:[%s716_s2 + $0x10] sm:$0xff] %v478_v52  ;;  %v366_v58 = vadd.f32 %v365_v50, %v326_v45 }
  0xfc   :  { %426 = vst [vmem:[%s716_s2 + $0x18] sm:$0xff] %v479_v53  ;;  %v362_v59 = vadd.f32 %v361_v54, %v324_v39  ;;  %v386_v61 = vadd.f32 %v385_v55, %v379_v46 }
  0xfd   :  { %v367_v63 = vadd.f32 %v366_v58, %v328_v49  ;;  %v391_v0 = vadd.f32 %v390_v57, %v383_v56 }
  0xfe   :  { %363 = vadd.xlane.f32.xlu0 %v362_v59  ;;  %v387_v1 = vadd.f32 %v386_v61, %v380_v60 }
  0xff   :  { %v392_v2 = vadd.f32 %v391_v0, %v384_v62 }
 0x100   :  { %388 = vadd.xlane.f32.xlu1 %v387_v1 }
 0x102   :  { %368 = vadd.xlane.f32.xlu0 %v367_v63 }
 0x104   :  { %393 = vadd.xlane.f32.xlu1 %v392_v2 }
 0x18b   :  { %v364_v4 = vpop.xlane.xlu0 %363 }
 0x18c   :  { %v370_v6 = vadd.f32 %v364_v4, %v358_v3 }
 0x18d   :  { %v389_v7 = vpop.xlane.xlu1 %388 }
 0x18e   :  { %373 = vst.msk [vmem:[%s715_s3] sm:$0xff] %vm32_vm0, %v370_v6  ;;  %v395_v9 = vadd.f32 %v389_v7, %v375_v5 }
 0x18f   :  { %v369_v10 = vpop.xlane.xlu0 %368 }
 0x190   :  { %397 = vst.msk [vmem:[%s717_s4] sm:$0xff] %vm32_vm0, %v395_v9  ;;  %v371_v12 = vadd.f32 %v369_v10, %v359_v8 }
 0x191   :  { %v394_v13 = vpop.xlane.xlu1 %393 }
 0x192   :  { %374 = vst.msk [vmem:[%s715_s3 + $0x8] sm:$0xff] %vm32_vm0, %v371_v12  ;;  %v396_v14 = vadd.f32 %v394_v13, %v376_v11 }
 0x194   :  { %398 = vst.msk [vmem:[%s717_s4 + $0x8] sm:$0xff] %vm32_vm0, %v396_v14 }

// kernel: discriminator_forward.9
= control target key start
LH: loop header
LB: loop body
LE: loop exit
PB: predicated region body
PF: predicated region fallthrough
CT: control target
= control target key end

     0   :  { %v125_v0 = vmov 0   ;;  %s182_s2 = inlined_call_operand.vmem [shape: f32[16,1], index: 2, kind: input, shape index: {}]   ;;  %s183_s1 = inlined_call_operand.vmem [shape: f32[16,1], index: 1, kind: input, shape index: {}]   ;;  %s184_s0 = inlined_call_operand.vmem [shape: bf16[16,512], index: 0, kind: input, shape index: {}]   ;;  %s185_s3 = inlined_call_operand.vmem [shape: bf16[16,512], index: 3, kind: output, shape index: {}]  }
   0x1   :  { %124 = vset.pattern.permute.xlu1 %v125_v0  ;;  %123 = vset.pattern.permute.xlu0 %v125_v0  ;;  %v46_v1 = vld [vmem:[%s182_s2] sm:$0xff]  ;;  %v47_v3 = vld [vmem:[%s182_s2 + $0x8] sm:$0xff]  ;;  %v16_v11 = vld [vmem:[%s184_s0 + $0x10] sm:$0xff] }
   0x2   :  { %v26_v2 = vld [vmem:[%s183_s1] sm:$0xff]  ;;  %50 = vperm.xlu1 %124, %v46_v1   ;;  %v27_v4 = vld [vmem:[%s183_s1 + $0x8] sm:$0xff]  ;;  %v17_v12 = vld [vmem:[%s184_s0 + $0x18] sm:$0xff]  ;;  %v22_v15 = vunpack.c.l.bf16 %v16_v11  ;;  %v23_v20 = vunpack.c.h.bf16 %v16_v11 }
   0x3   :  { %30 = vperm.xlu0 %123, %v26_v2   ;;  %v14_v5 = vld [vmem:[%s184_s0] sm:$0xff]  ;;  %v15_v6 = vld [vmem:[%s184_s0 + $0x8] sm:$0xff]  ;;  %v24_v21 = vunpack.c.l.bf16 %v17_v12  ;;  %v25_v22 = vunpack.c.h.bf16 %v17_v12 }
   0x4   :  { %v18_v7 = vunpack.c.l.bf16 %v14_v5  ;;  %v19_v8 = vunpack.c.h.bf16 %v14_v5  ;;  %v20_v9 = vunpack.c.l.bf16 %v15_v6  ;;  %v21_v10 = vunpack.c.h.bf16 %v15_v6 }
   0x6   :  { %55 = vperm.xlu1 %124, %v47_v3  }
   0x7   :  { %35 = vperm.xlu0 %123, %v27_v4  }
  0x81   :  { %v51_v13 = vpop.permute.xlu1 %50 }
  0x82   :  { %v31_v14 = vpop.permute.xlu0 %30 }
  0x83   :  { %v38_v16 = vmul.f32 %v31_v14, %v18_v7  ;;  %v39_v17 = vmul.f32 %v31_v14, %v19_v8  ;;  %v40_v18 = vmul.f32 %v31_v14, %v20_v9  ;;  %v41_v19 = vmul.f32 %v31_v14, %v21_v10 }
  0x85   :  { %v58_v23 = vadd.f32 %v51_v13, %v38_v16  ;;  %v59_v24 = vadd.f32 %v51_v13, %v39_v17  ;;  %v60_v25 = vadd.f32 %v51_v13, %v40_v18  ;;  %v61_v26 = vadd.f32 %v51_v13, %v41_v19  ;;  %v56_v33 = vpop.permute.xlu1 %55 }
  0x86   :  { %v36_v27 = vpop.permute.xlu0 %35 }
  0x87   :  { %v66_v28 = vmul.f32 0.2, %v58_v23  ;;  %v67_v29 = vmul.f32 0.2, %v59_v24  ;;  %v68_v30 = vmul.f32 0.2, %v60_v25  ;;  %v42_v31 = vmul.f32 %v36_v27, %v22_v15 }
  0x88   :  { %v69_v32 = vmul.f32 0.2, %v61_v26  ;;  %v43_v34 = vmul.f32 %v36_v27, %v23_v20  ;;  %v44_v35 = vmul.f32 %v36_v27, %v24_v21  ;;  %v45_v36 = vmul.f32 %v36_v27, %v25_v22 }
  0x89   :  { %v74_v37 = vmax.f32 %v58_v23, %v66_v28  ;;  %v75_v38 = vmax.f32 %v59_v24, %v67_v29  ;;  %v76_v39 = vmax.f32 %v60_v25, %v68_v30  ;;  %v62_v40 = vadd.f32 %v56_v33, %v42_v31 }
  0x8a   :  { %v77_v41 = vmax.f32 %v61_v26, %v69_v32  ;;  %v63_v42 = vadd.f32 %v56_v33, %v43_v34  ;;  %v64_v43 = vadd.f32 %v56_v33, %v44_v35  ;;  %v65_v44 = vadd.f32 %v56_v33, %v45_v36 }
  0x8b   :  { %v118_v45 = vpack.c.bf16 %v75_v38, %v74_v37  ;;  %v70_v46 = vmul.f32 0.2, %v62_v40 }
  0x8c   :  { %v119_v47 = vpack.c.bf16 %v77_v41, %v76_v39  ;;  %v71_v48 = vmul.f32 0.2, %v63_v42  ;;  %v72_v49 = vmul.f32 0.2, %v64_v43  ;;  %v73_v50 = vmul.f32 0.2, %v65_v44 }
  0x8d   :  { %106 = vst [vmem:[%s185_s3] sm:$0xff] %v118_v45  ;;  %v78_v51 = vmax.f32 %v62_v40, %v70_v46 }
  0x8e   :  { %107 = vst [vmem:[%s185_s3 + $0x8] sm:$0xff] %v119_v47  ;;  %v79_v52 = vmax.f32 %v63_v42, %v71_v48  ;;  %v80_v53 = vmax.f32 %v64_v43, %v72_v49  ;;  %v81_v54 = vmax.f32 %v65_v44, %v73_v50 }
  0x90   :  { %v120_v55 = vpack.c.bf16 %v79_v52, %v78_v51  ;;  %v121_v56 = vpack.c.bf16 %v81_v54, %v80_v53 }
  0x92   :  { %108 = vst [vmem:[%s185_s3 + $0x10] sm:$0xff] %v120_v55  ;;  %109 = vst [vmem:[%s185_s3 + $0x18] sm:$0xff] %v121_v56 }

// kernel: discriminator_forward.10
= control target key start
LH: loop header
LB: loop body
LE: loop exit
PB: predicated region body
PF: predicated region fallthrough
CT: control target
= control target key end

     0   :  { %vm28_vm0 = vcmask 7168   ;;  %v440_v20 = vmov 0.0   ;;  %s620_s1 = inlined_call_operand.vmem [shape: bf16[256,128], index: 1, kind: input, shape index: {}]   ;;  %s621_s0 = inlined_call_operand.vmem [shape: bf16[32,256], index: 0, kind: input, shape index: {}]   ;;  %s622_s3 = inlined_call_operand.vmem [shape: f32[32,1], index: 3, kind: output, shape index: {1}]   ;;  %s623_s2 = inlined_call_operand.vmem [shape: bf16[32,128], index: 2, kind: output, shape index: {0}]   ;;  %s624_s4 = inlined_call_operand.vmem [shape: f32[32,1], index: 4, kind: output, shape index: {2}]  }
   0x1   :  { %v418_v0 = vld [vmem:[%s620_s1 + $0x40] sm:$0xff]   ;;  %v420_v2 = vld [vmem:[%s620_s1 + $0x48] sm:$0xff]   ;;  %v422_v4 = vld [vmem:[%s620_s1 + $0x50] sm:$0xff]   ;;  %31 = vst.msk [vmem:[%s622_s3 + $0x10] sm:$0xff] %vm28_vm0, %v440_v20 }
   0x2   :  { %v419_v1 = vld [vmem:[%s620_s1] sm:$0xff]   ;;  %373 = vmatprep.subr.bf16.mxu0 %v418_v0  ;;  %401 = vmatprep.subr.bf16.mxu1 %v418_v0  ;;  %v421_v3 = vld [vmem:[%s620_s1 + $0x8] sm:$0xff]   ;;  %v423_v5 = vld [vmem:[%s620_s1 + $0x10] sm:$0xff]   ;;  %29 = vst.msk [vmem:[%s622_s3] sm:$0xff] %vm28_vm0, %v440_v20 }
   0x3   :  { %374 = vmatpush3.bf16.msra.mxu0 %v419_v1  ;;  %409 = vmatpush3.bf16.msra.mxu1 %v419_v1  ;;  %v424_v6 = vld [vmem:[%s620_s1 + $0x58] sm:$0xff]   ;;  %v426_v8 = vld [vmem:[%s620_s1 + $0x60] sm:$0xff]   ;;  %v428_v10 = vld [vmem:[%s620_s1 + $0x68] sm:$0xff]   ;;  %30 = vst.msk [vmem:[%s622_s3 + $0x8] sm:$0xff] %vm28_vm0, %v440_v20 }
   0x4   :  { %375 = vmatprep.subr.bf16.mxu0 %v420_v2  ;;  %402 = vmatprep.subr.bf16.mxu1 %v420_v2  ;;  %v425_v7 = vld [vmem:[%s620_s1 + $0x18] sm:$0xff]   ;;  %v427_v9 = vld [vmem:[%s620_s1 + $0x20] sm:$0xff]   ;;  %v429_v13 = vld [vmem:[%s620_s1 + $0x28] sm:$0xff]   ;;  %32 = vst.msk [vmem:[%s622_s3 + $0x18] sm:$0xff] %vm28_vm0, %v440_v20 }
   0x5   :  { %v436_v11 = vld [vmem:[%s621_s0 + $0x4] ss:$8 sps:$4 sm:$0xff]   ;;  %v439_v12 = vld [vmem:[%s621_s0 + $0x14] ss:$8 sps:$4 sm:$0xff]   ;;  %v434_v18 = vld [vmem:[%s621_s0] ss:$8 sps:$4 sm:$0xff]  }
   0x6   :  { %v430_v14 = vld [vmem:[%s620_s1 + $0x70] sm:$0xff]   ;;  %225 = vmatprep.mubr.bf16.mxu0 %v436_v11  ;;  %233 = vmatprep.mubr.bf16.mxu1 %v439_v12  ;;  %v432_v16 = vld [vmem:[%s620_s1 + $0x78] sm:$0xff]   ;;  %34 = vst.msk [vmem:[%s624_s4 + $0x8] sm:$0xff] %vm28_vm0, %v440_v20  ;;  %33 = vst.msk [vmem:[%s624_s4] sm:$0xff] %vm28_vm0, %v440_v20 }
   0x7   :  { %376 = vmatpush3.bf16.msra.mxu0 %v421_v3  ;;  %410 = vmatpush3.bf16.msra.mxu1 %v421_v3  ;;  %v431_v15 = vld [vmem:[%s620_s1 + $0x30] sm:$0xff]   ;;  %v433_v17 = vld [vmem:[%s620_s1 + $0x38] sm:$0xff]   ;;  %35 = vst.msk [vmem:[%s624_s4 + $0x10] sm:$0xff] %vm28_vm0, %v440_v20  ;;  %36 = vst.msk [vmem:[%s624_s4 + $0x18] sm:$0xff] %vm28_vm0, %v440_v20 }
   0x8   :  { %377 = vmatprep.subr.bf16.mxu0 %v422_v4  ;;  %403 = vmatprep.subr.bf16.mxu1 %v422_v4  ;;  %v437_v19 = vld [vmem:[%s621_s0 + $0x10] ss:$8 sps:$4 sm:$0xff]  }
   0x9   :  { %v259_v39 = vld [vmem:[%s622_s3 + $0x10] sm:$0xff]  ;;  %v257_v40 = vld [vmem:[%s622_s3] sm:$0xff] }
   0xa   :  { %v258_v46 = vld [vmem:[%s622_s3 + $0x8] sm:$0xff] }
   0xb   :  { %378 = vmatpush3.bf16.msra.mxu0 %v423_v5  ;;  %411 = vmatpush3.bf16.msra.mxu1 %v423_v5  ;;  %v260_v45 = vld [vmem:[%s622_s3 + $0x18] sm:$0xff] }
   0xc   :  { %379 = vmatprep.subr.bf16.mxu0 %v424_v6  ;;  %404 = vmatprep.subr.bf16.mxu1 %v424_v6 }
   0xd   :  { %v279_v51 = vld [vmem:[%s624_s4 + $0x8] sm:$0xff]  ;;  %v278_v52 = vld [vmem:[%s624_s4] sm:$0xff] }
   0xe   :  { %v281_v57 = vld [vmem:[%s624_s4 + $0x18] sm:$0xff]  ;;  %v280_v58 = vld [vmem:[%s624_s4 + $0x10] sm:$0xff] }
   0xf   :  { %380 = vmatpush3.bf16.msra.mxu0 %v425_v7  ;;  %412 = vmatpush3.bf16.msra.mxu1 %v425_v7 }
  0x10   :  { %381 = vmatprep.subr.bf16.mxu0 %v426_v8  ;;  %405 = vmatprep.subr.bf16.mxu1 %v426_v8 }
  0x13   :  { %382 = vmatpush3.bf16.msra.mxu0 %v427_v9  ;;  %413 = vmatpush3.bf16.msra.mxu1 %v427_v9 }
  0x14   :  { %383 = vmatprep.subr.bf16.mxu0 %v428_v10  ;;  %406 = vmatprep.subr.bf16.mxu1 %v428_v10 }
  0x17   :  { %384 = vmatpush3.bf16.msra.mxu0 %v429_v13  ;;  %414 = vmatpush3.bf16.msra.mxu1 %v429_v13 }
  0x18   :  { %385 = vmatprep.subr.bf16.mxu0 %v430_v14  ;;  %407 = vmatprep.subr.bf16.mxu1 %v430_v14 }
  0x1b   :  { %386 = vmatpush3.bf16.msra.mxu0 %v431_v15  ;;  %415 = vmatpush3.bf16.msra.mxu1 %v431_v15 }
  0x1c   :  { %387 = vmatprep.subr.bf16.mxu0 %v432_v16  ;;  %408 = vmatprep.subr.bf16.mxu1 %v432_v16 }
  0x1f   :  { %388 = vmatpush3.bf16.msra.mxu0 %v433_v17  ;;  %416 = vmatpush3.bf16.msra.mxu1 %v433_v17 }
  0x22   :  { %226 = vmatmul.mubr.bf16.vlgmr.msra.gmra.mrb[0].mxu0 %v434_v18  ;;  %234 = vmatmul.mubr.bf16.vlgmr.msra.gmra.mrb[0].mxu1 %v437_v19 }
  0xf5   :  { %v389_v21 = vpop.f32.mrb[0].mxu0  ;;  %v395_v22 = vpop.f32.mrb[0].mxu1 }
  0xf6   :  { %v390_v23 = vpop.f32.mrb[1].mxu0  ;;  %v396_v24 = vpop.f32.mrb[1].mxu1 }
  0xf7   :  { %v391_v25 = vadd.f32 %v390_v23, %v389_v21  ;;  %v397_v26 = vadd.f32 %v396_v24, %v395_v22  ;;  %v392_v27 = vpop.f32.mrb[2].mxu0  ;;  %v398_v28 = vpop.f32.mrb[2].mxu1 }
  0xf8   :  { %v393_v29 = vpop.f32.mrb[3].mxu0  ;;  %v399_v30 = vpop.f32.mrb[3].mxu1 }
  0xf9   :  { %v394_v31 = vadd.f32 %v393_v29, %v392_v27  ;;  %v400_v32 = vadd.f32 %v399_v30, %v398_v28  ;;  %265 = vadd.xlane.f32.xlu1 %v397_v26  ;;  %261 = vadd.xlane.f32.xlu0 %v391_v25  ;;  %v282_v36 = vmul.f32 %v391_v25, %v391_v25 }
  0xfa   :  { %v284_v38 = vmul.f32 %v397_v26, %v397_v26 }
  0xfb   :  { %v365_v33 = vpack.c.bf16 %v394_v31, %v391_v25  ;;  %v370_v34 = vpack.c.bf16 %v400_v32, %v397_v26  ;;  %v283_v35 = vmul.f32 %v394_v31, %v394_v31  ;;  %v285_v37 = vmul.f32 %v400_v32, %v400_v32 }
  0xfd   :  { %366 = vst [vmem:[%s623_s2] sm:$0xff] %v365_v33   ;;  %372 = vst [vmem:[%s623_s2 + $0x8] sm:$0xff] %v370_v34   ;;  %267 = vadd.xlane.f32.xlu1 %v400_v32  ;;  %263 = vadd.xlane.f32.xlu0 %v394_v31 }
 0x101   :  { %288 = vadd.xlane.f32.xlu1 %v283_v35  ;;  %286 = vadd.xlane.f32.xlu0 %v282_v36 }
 0x105   :  { %292 = vadd.xlane.f32.xlu1 %v285_v37  ;;  %290 = vadd.xlane.f32.xlu0 %v284_v38 }
 0x186   :  { %v266_v41 = vpop.xlane.xlu1 %265  ;;  %v262_v42 = vpop.xlane.xlu0 %261 }
 0x187   :  { %v271_v43 = vadd.f32 %v266_v41, %v259_v39  ;;  %v269_v44 = vadd.f32 %v262_v42, %v257_v40 }
 0x189   :  { %276 = vst.msk [vmem:[%s622_s3 + $0x10] sm:$0xff] %vm28_vm0, %v271_v43  ;;  %274 = vst.msk [vmem:[%s622_s3] sm:$0xff] %vm28_vm0, %v269_v44 }
 0x18a   :  { %v268_v47 = vpop.xlane.xlu1 %267  ;;  %v264_v48 = vpop.xlane.xlu0 %263 }
 0x18b   :  { %v272_v49 = vadd.f32 %v268_v47, %v260_v45  ;;  %v270_v50 = vadd.f32 %v264_v48, %v258_v46 }
 0x18d   :  { %277 = vst.msk [vmem:[%s622_s3 + $0x18] sm:$0xff] %vm28_vm0, %v272_v49  ;;  %275 = vst.msk [vmem:[%s622_s3 + $0x8] sm:$0xff] %vm28_vm0, %v270_v50 }
 0x18e   :  { %v289_v53 = vpop.xlane.xlu1 %288  ;;  %v287_v54 = vpop.xlane.xlu0 %286 }
 0x18f   :  { %v295_v55 = vadd.f32 %v289_v53, %v279_v51  ;;  %v294_v56 = vadd.f32 %v287_v54, %v278_v52 }
 0x191   :  { %299 = vst.msk [vmem:[%s624_s4 + $0x8] sm:$0xff] %vm28_vm0, %v295_v55  ;;  %298 = vst.msk [vmem:[%s624_s4] sm:$0xff] %vm28_vm0, %v294_v56 }
 0x192   :  { %v293_v59 = vpop.xlane.xlu1 %292  ;;  %v291_v60 = vpop.xlane.xlu0 %290 }
 0x193   :  { %v297_v61 = vadd.f32 %v293_v59, %v281_v57  ;;  %v296_v62 = vadd.f32 %v291_v60, %v280_v58 }
 0x195   :  { %301 = vst.msk [vmem:[%s624_s4 + $0x18] sm:$0xff] %vm28_vm0, %v297_v61  ;;  %300 = vst.msk [vmem:[%s624_s4 + $0x10] sm:$0xff] %vm28_vm0, %v296_v62 }

// kernel: discriminator_forward.11
= control target key start
LH: loop header
LB: loop body
LE: loop exit
PB: predicated region body
PF: predicated region fallthrough
CT: control target
= control target key end

     0   :  { %v141_v0 = vmov 0   ;;  %s198_s1 = inlined_call_operand.vmem [shape: f32[32,1], index: 1, kind: input, shape index: {}]   ;;  %s199_s2 = inlined_call_operand.vmem [shape: f32[32,1], index: 2, kind: input, shape index: {}]   ;;  %s200_s0 = inlined_call_operand.vmem [shape: bf16[32,128], index: 0, kind: input, shape index: {}]   ;;  %s201_s3 = inlined_call_operand.vmem [shape: bf16[32,128], index: 3, kind: output, shape index: {}]  }
   0x1   :  { %140 = vset.pattern.permute.xlu1 %v141_v0  ;;  %139 = vset.pattern.permute.xlu0 %v141_v0  ;;  %v24_v1 = vld [vmem:[%s198_s1 + $0x10] sm:$0xff]  ;;  %v22_v2 = vld [vmem:[%s198_s1] sm:$0xff]  ;;  %v25_v3 = vld [vmem:[%s198_s1 + $0x18] sm:$0xff] }
   0x2   :  { %38 = vperm.xlu1 %140, %v24_v1   ;;  %28 = vperm.xlu0 %139, %v22_v2   ;;  %v23_v4 = vld [vmem:[%s198_s1 + $0x8] sm:$0xff]  ;;  %v50_v6 = vld [vmem:[%s199_s2] sm:$0xff]  ;;  %v53_v7 = vld [vmem:[%s199_s2 + $0x18] sm:$0xff] }
   0x3   :  { %v51_v5 = vld [vmem:[%s199_s2 + $0x8] sm:$0xff]  ;;  %v52_v8 = vld [vmem:[%s199_s2 + $0x10] sm:$0xff]  ;;  %v119_v11 = vld [vmem:[%s200_s0] sm:$0xff]  }
   0x4   :  { %v120_v12 = vunpack.c.l.bf16 %v119_v11  ;;  %v121_v13 = vunpack.c.h.bf16 %v119_v11  ;;  %v136_v14 = vld [vmem:[%s200_s0 + $0x8] sm:$0xff]  }
   0x5   :  { %v124_v17 = vunpack.c.l.bf16 %v136_v14  ;;  %v125_v19 = vunpack.c.h.bf16 %v136_v14 }
   0x6   :  { %43 = vperm.xlu1 %140, %v25_v3   ;;  %33 = vperm.xlu0 %139, %v23_v4  }
   0xa   :  { %61 = vperm.xlu1 %140, %v51_v5   ;;  %56 = vperm.xlu0 %139, %v50_v6  }
   0xe   :  { %71 = vperm.xlu1 %140, %v53_v7   ;;  %66 = vperm.xlu0 %139, %v52_v8  }
  0x81   :  { %v39_v9 = vpop.permute.xlu1 %38  ;;  %v29_v10 = vpop.permute.xlu0 %28 }
  0x82   :  { %v46_v18 = vmul.f32 %v120_v12, %v29_v10  ;;  %v48_v25 = vmul.f32 %v124_v17, %v39_v9 }
  0x85   :  { %v44_v15 = vpop.permute.xlu1 %43  ;;  %v34_v16 = vpop.permute.xlu0 %33 }
  0x86   :  { %v47_v20 = vmul.f32 %v121_v13, %v34_v16  ;;  %v49_v26 = vmul.f32 %v125_v19, %v44_v15 }
  0x89   :  { %v62_v21 = vpop.permute.xlu1 %61  ;;  %v57_v22 = vpop.permute.xlu0 %56 }
  0x8a   :  { %v75_v23 = vadd.f32 %v62_v21, %v47_v20  ;;  %v74_v24 = vadd.f32 %v57_v22, %v46_v18 }
  0x8c   :  { %v79_v27 = vmul.f32 0.2, %v75_v23  ;;  %v78_v28 = vmul.f32 0.2, %v74_v24 }
  0x8d   :  { %v72_v29 = vpop.permute.xlu1 %71  ;;  %v67_v30 = vpop.permute.xlu0 %66 }
  0x8e   :  { %v83_v31 = vmax.f32 %v75_v23, %v79_v27  ;;  %v82_v32 = vmax.f32 %v74_v24, %v78_v28  ;;  %v77_v33 = vadd.f32 %v72_v29, %v49_v26  ;;  %v76_v34 = vadd.f32 %v67_v30, %v48_v25 }
  0x90   :  { %v129_v35 = vpack.c.bf16 %v83_v31, %v82_v32  ;;  %v81_v36 = vmul.f32 0.2, %v77_v33  ;;  %v80_v37 = vmul.f32 0.2, %v76_v34 }
  0x92   :  { %130 = vst [vmem:[%s201_s3] sm:$0xff] %v129_v35   ;;  %v85_v38 = vmax.f32 %v77_v33, %v81_v36  ;;  %v84_v39 = vmax.f32 %v76_v34, %v80_v37 }
  0x94   :  { %v134_v40 = vpack.c.bf16 %v85_v38, %v84_v39 }
  0x96   :  { %137 = vst [vmem:[%s201_s3 + $0x8] sm:$0xff] %v134_v40  }

// kernel: discriminator_forward.13
= control target key start
LH: loop header
LB: loop body
LE: loop exit
PB: predicated region body
PF: predicated region fallthrough
CT: control target
= control target key end

     0   :  { %v241_v0 = vmov 0   ;;  %vm190_vm0 = vcmask 257024   ;;  %s354_s1 = inlined_call_operand.vmem [shape: f32[64,1], index: 1, kind: input, shape index: {}]   ;;  %s355_s2 = inlined_call_operand.vmem [shape: f32[64,1], index: 2, kind: input, shape index: {}]   ;;  %s356_s0 = inlined_call_operand.vmem [shape: bf16[64,32], index: 0, kind: input, shape index: {}]   ;;  %s357_s3 = inlined_call_operand.vmem [shape: bf16[64,32], index: 3, kind: output, shape index: {}]  }
   0x1   :  { %240 = vset.pattern.permute.xlu1 %v241_v0  ;;  %239 = vset.pattern.permute.xlu0 %v241_v0  ;;  %v32_v1 = vld [vmem:[%s354_s1 + $0x10] sm:$0xff]  ;;  %v30_v2 = vld [vmem:[%s354_s1] sm:$0xff]  ;;  %v33_v3 = vld [vmem:[%s354_s1 + $0x18] sm:$0xff] }
   0x2   :  { %50 = vperm.xlu1 %240, %v32_v1   ;;  %40 = vperm.xlu0 %239, %v30_v2   ;;  %v31_v4 = vld [vmem:[%s354_s1 + $0x8] sm:$0xff]  ;;  %v34_v6 = vld [vmem:[%s354_s1 + $0x20] sm:$0xff]  ;;  %v37_v7 = vld [vmem:[%s354_s1 + $0x38] sm:$0xff] }
   0x3   :  { %v35_v5 = vld [vmem:[%s354_s1 + $0x28] sm:$0xff]  ;;  %v36_v8 = vld [vmem:[%s354_s1 + $0x30] sm:$0xff]  ;;  %v86_v10 = vld [vmem:[%s355_s2] sm:$0xff] }
   0x4   :  { %v87_v9 = vld [vmem:[%s355_s2 + $0x8] sm:$0xff]  ;;  %v89_v11 = vld [vmem:[%s355_s2 + $0x18] sm:$0xff]  ;;  %v88_v12 = vld [vmem:[%s355_s2 + $0x10] sm:$0xff] }
   0x5   :  { %v91_v13 = vld [vmem:[%s355_s2 + $0x28] sm:$0xff]  ;;  %v90_v14 = vld [vmem:[%s355_s2 + $0x20] sm:$0xff]  ;;  %v93_v15 = vld [vmem:[%s355_s2 + $0x38] sm:$0xff] }
   0x6   :  { %55 = vperm.xlu1 %240, %v33_v3   ;;  %45 = vperm.xlu0 %239, %v31_v4   ;;  %v92_v16 = vld [vmem:[%s355_s2 + $0x30] sm:$0xff]  ;;  %v220_v21 = vld [vmem:[%s356_s0] sm:$0xff]   ;;  %v235_v26 = vld [vmem:[%s356_s0 + $0x8] sm:$0xff]  }
   0x7   :  { %v221_v24 = vunpack.c.l.bf16 %v220_v21  ;;  %v222_v25 = vunpack.c.h.bf16 %v220_v21  ;;  %v225_v29 = vunpack.c.l.bf16 %v235_v26  ;;  %v226_v31 = vunpack.c.h.bf16 %v235_v26  ;;  %v236_v33 = vld [vmem:[%s356_s0 + $0x10] sm:$0xff]   ;;  %v237_v36 = vld [vmem:[%s356_s0 + $0x18] sm:$0xff]  }
   0x8   :  { %v230_v39 = vunpack.c.h.bf16 %v236_v33  ;;  %v229_v40 = vunpack.c.l.bf16 %v236_v33  ;;  %v234_v45 = vunpack.c.h.bf16 %v237_v36  ;;  %v233_v54 = vunpack.c.l.bf16 %v237_v36 }
   0xa   :  { %65 = vperm.xlu1 %240, %v35_v5   ;;  %60 = vperm.xlu0 %239, %v34_v6  }
   0xe   :  { %75 = vperm.xlu1 %240, %v37_v7   ;;  %70 = vperm.xlu0 %239, %v36_v8  }
  0x12   :  { %101 = vperm.xlu1 %240, %v87_v9   ;;  %96 = vperm.xlu0 %239, %v86_v10  }
  0x16   :  { %111 = vperm.xlu1 %240, %v89_v11   ;;  %106 = vperm.xlu0 %239, %v88_v12  }
  0x1a   :  { %121 = vperm.xlu1 %240, %v91_v13   ;;  %116 = vperm.xlu0 %239, %v90_v14  }
  0x1e   :  { %131 = vperm.xlu1 %240, %v93_v15   ;;  %126 = vperm.xlu0 %239, %v92_v16  }
  0x81   :  { %v51_v17 = vpop.permute.xlu1 %50  ;;  %v41_v18 = vpop.permute.xlu0 %40 }
  0x82   :  { %v78_v30 = vmul.f32 %v221_v24, %v41_v18  ;;  %v80_v41 = vmul.f32 %v225_v29, %v51_v17 }
  0x85   :  { %v56_v19 = vpop.permute.xlu1 %55  ;;  %v46_v20 = vpop.permute.xlu0 %45 }
  0x86   :  { %v79_v32 = vmul.f32 %v222_v25, %v46_v20  ;;  %v81_v42 = vmul.f32 %v226_v31, %v56_v19 }
  0x89   :  { %v66_v22 = vpop.permute.xlu1 %65  ;;  %v61_v23 = vpop.permute.xlu0 %60 }
  0x8a   :  { %v83_v52 = vmul.f32 %v230_v39, %v66_v22  ;;  %v82_v53 = vmul.f32 %v229_v40, %v61_v23 }
  0x8d   :  { %v76_v27 = vpop.permute.xlu1 %75  ;;  %v71_v28 = vpop.permute.xlu0 %70 }
  0x8e   :  { %v85_v1 = vmul.f32 %v234_v45, %v76_v27  ;;  %v84_v2 = vmul.f32 %v233_v54, %v71_v28 }
  0x91   :  { %v102_v34 = vpop.permute.xlu1 %101  ;;  %v97_v35 = vpop.permute.xlu0 %96 }
  0x92   :  { %v135_v37 = vadd.f32 %v102_v34, %v79_v32  ;;  %v134_v38 = vadd.f32 %v97_v35, %v78_v30 }
  0x94   :  { %v143_v43 = vmul.f32 0.2, %v135_v37  ;;  %v142_v44 = vmul.f32 0.2, %v134_v38 }
  0x95   :  { %v112_v46 = vpop.permute.xlu1 %111  ;;  %v107_v47 = vpop.permute.xlu0 %106 }
  0x96   :  { %v151_v48 = vmax.f32 %v135_v37, %v143_v43  ;;  %v150_v49 = vmax.f32 %v134_v38, %v142_v44  ;;  %v137_v50 = vadd.f32 %v112_v46, %v81_v42  ;;  %v136_v51 = vadd.f32 %v107_v47, %v80_v41 }
  0x98   :  { %v212_v55 = vpack.c.bf16 %v151_v48, %v151_v48  ;;  %v211_v56 = vpack.c.bf16 %v150_v49, %v150_v49  ;;  %v145_v57 = vmul.f32 0.2, %v137_v50  ;;  %v144_v58 = vmul.f32 0.2, %v136_v51 }
  0x99   :  { %v122_v59 = vpop.permute.xlu1 %121  ;;  %v117_v60 = vpop.permute.xlu0 %116 }
  0x9a   :  { %192 = vst.msk [vmem:[%s357_s3 + $0x4] sm:$0xf] %vm190_vm0, %v212_v55  ;;  %191 = vst.msk [vmem:[%s357_s3] sm:$0xf] %vm190_vm0, %v211_v56  ;;  %v153_v61 = vmax.f32 %v137_v50, %v145_v57  ;;  %v152_v62 = vmax.f32 %v136_v51, %v144_v58  ;;  %v139_v63 = vadd.f32 %v122_v59, %v83_v52 }
  0x9b   :  { %v138_v0 = vadd.f32 %v117_v60, %v82_v53 }
  0x9c   :  { %v214_v3 = vpack.c.bf16 %v153_v61, %v153_v61  ;;  %v213_v4 = vpack.c.bf16 %v152_v62, %v152_v62  ;;  %v147_v5 = vmul.f32 0.2, %v139_v63 }
  0x9d   :  { %v146_v6 = vmul.f32 0.2, %v138_v0  ;;  %v132_v7 = vpop.permute.xlu1 %131  ;;  %v127_v8 = vpop.permute.xlu0 %126 }
  0x9e   :  { %194 = vst.msk [vmem:[%s357_s3 + $0xc] sm:$0xf] %vm190_vm0, %v214_v3  ;;  %193 = vst.msk [vmem:[%s357_s3 + $0x8] sm:$0xf] %vm190_vm0, %v213_v4  ;;  %v155_v9 = vmax.f32 %v139_v63, %v147_v5  ;;  %v141_v11 = vadd.f32 %v132_v7, %v85_v1  ;;  %v140_v12 = vadd.f32 %v127_v8, %v84_v2 }
  0x9f   :  { %v154_v10 = vmax.f32 %v138_v0, %v146_v6 }
  0xa0   :  { %v216_v13 = vpack.c.bf16 %v155_v9, %v155_v9  ;;  %v149_v15 = vmul.f32 0.2, %v141_v11  ;;  %v148_v16 = vmul.f32 0.2, %v140_v12 }
  0xa1   :  { %v215_v14 = vpack.c.bf16 %v154_v10, %v154_v10 }
  0xa2   :  { %196 = vst.msk [vmem:[%s357_s3 + $0x14] sm:$0xf] %vm190_vm0, %v216_v13  ;;  %v157_v17 = vmax.f32 %v141_v11, %v149_v15  ;;  %v156_v18 = vmax.f32 %v140_v12, %v148_v16 }
  0xa3   :  { %195 = vst.msk [vmem:[%s357_s3 + $0x10] sm:$0xf] %vm190_vm0, %v215_v14 }
  0xa4   :  { %v218_v19 = vpack.c.bf16 %v157_v17, %v157_v17  ;;  %v217_v20 = vpack.c.bf16 %v156_v18, %v156_v18 }
  0xa6   :  { %198 = vst.msk [vmem:[%s357_s3 + $0x1c] sm:$0xf] %vm190_vm0, %v218_v19  ;;  %197 = vst.msk [vmem:[%s357_s3 + $0x18] sm:$0xf] %vm190_vm0, %v217_v20 }

// kernel: discriminator_forward.12
= control target key start
LH: loop header
LB: loop body
LE: loop exit
PB: predicated region body
PF: predicated region fallthrough
CT: control target
= control target key end

     0   :  { %vm19_vm0 = vcmask 261120   ;;  %v927_v48 = vmov 0.0   ;;  %vm33_vm1 = vcmask 7168   ;;  %vm705_vm2 = vcmask 257024   ;;  %s1361_s1 = inlined_call_operand.vmem [shape: bf16[512,32], index: 1, kind: input, shape index: {}]   ;;  %s1362_s0 = inlined_call_operand.vmem [shape: bf16[64,512], index: 0, kind: input, shape index: {}]   ;;  %s1363_s3 = inlined_call_operand.vmem [shape: f32[64,1], index: 3, kind: output, shape index: {1}]   ;;  %s1364_s2 = inlined_call_operand.vmem [shape: bf16[64,32], index: 2, kind: output, shape index: {0}]   ;;  %s1365_s4 = inlined_call_operand.vmem [shape: f32[64,1], index: 4, kind: output, shape index: {2}]  }
   0x1   :  { %v871_v0 = vld [vmem:[%s1361_s1 + $0x40] sm:$0xff]   ;;  %v875_v4 = vld [vmem:[%s1361_s1 + $0x48] sm:$0xff]   ;;  %v879_v8 = vld [vmem:[%s1361_s1 + $0x50] sm:$0xff]   ;;  %20 = vst.msk [vmem:[#allocation2] sm:$0xff] %vm19_vm0, %v927_v48 }
   0x2   :  { %v872_v1 = vld [vmem:[%s1361_s1 + $0xc0] sm:$0xff]   ;;  %790 = vmatprep.subr.bf16.mxu0 %v871_v0  ;;  %v876_v5 = vld [vmem:[%s1361_s1 + $0xc8] sm:$0xff]   ;;  %v880_v9 = vld [vmem:[%s1361_s1 + $0xd0] sm:$0xff]   ;;  %21 = vst.msk [vmem:[#allocation2 + $0x8] sm:$0xff] %vm19_vm0, %v927_v48 }
   0x3   :  { %v873_v2 = vld [vmem:[%s1361_s1] sm:$0xff]   ;;  %830 = vmatprep.subr.bf16.mxu1 %v872_v1  ;;  %v877_v6 = vld [vmem:[%s1361_s1 + $0x8] sm:$0xff]   ;;  %v881_v10 = vld [vmem:[%s1361_s1 + $0x10] sm:$0xff]   ;;  %22 = vst.msk [vmem:[#allocation2 + $0x10] sm:$0xff] %vm19_vm0, %v927_v48 }
   0x4   :  { %v874_v3 = vld [vmem:[%s1361_s1 + $0x80] sm:$0xff]   ;;  %791 = vmatpush3.bf16.msra.mxu0 %v873_v2  ;;  %v878_v7 = vld [vmem:[%s1361_s1 + $0x88] sm:$0xff]   ;;  %v882_v11 = vld [vmem:[%s1361_s1 + $0x90] sm:$0xff]   ;;  %23 = vst.msk [vmem:[#allocation2 + $0x18] sm:$0xff] %vm19_vm0, %v927_v48 }
   0x5   :  { %831 = vmatpush3.bf16.msra.mxu1 %v874_v3  ;;  %792 = vmatprep.subr.bf16.mxu0 %v875_v4  ;;  %v883_v12 = vld [vmem:[%s1361_s1 + $0x58] sm:$0xff]   ;;  %v887_v16 = vld [vmem:[%s1361_s1 + $0x60] sm:$0xff]   ;;  %v891_v20 = vld [vmem:[%s1361_s1 + $0x68] sm:$0xff]   ;;  %24 = vst.msk [vmem:[#allocation2 + $0x20] sm:$0xff] %vm19_vm0, %v927_v48 }
   0x6   :  { %832 = vmatprep.subr.bf16.mxu1 %v876_v5  ;;  %v884_v13 = vld [vmem:[%s1361_s1 + $0xd8] sm:$0xff]   ;;  %v888_v17 = vld [vmem:[%s1361_s1 + $0xe0] sm:$0xff]   ;;  %v892_v21 = vld [vmem:[%s1361_s1 + $0xe8] sm:$0xff]   ;;  %25 = vst.msk [vmem:[#allocation2 + $0x28] sm:$0xff] %vm19_vm0, %v927_v48 }
   0x7   :  { %v885_v14 = vld [vmem:[%s1361_s1 + $0x18] sm:$0xff]   ;;  %v889_v18 = vld [vmem:[%s1361_s1 + $0x20] sm:$0xff]   ;;  %v893_v22 = vld [vmem:[%s1361_s1 + $0x28] sm:$0xff]   ;;  %26 = vst.msk [vmem:[#allocation2 + $0x30] sm:$0xff] %vm19_vm0, %v927_v48 }
   0x8   :  { %793 = vmatpush3.bf16.msra.mxu0 %v877_v6  ;;  %v886_v15 = vld [vmem:[%s1361_s1 + $0x98] sm:$0xff]   ;;  %v890_v19 = vld [vmem:[%s1361_s1 + $0xa0] sm:$0xff]   ;;  %v894_v23 = vld [vmem:[%s1361_s1 + $0xa8] sm:$0xff]   ;;  %27 = vst.msk [vmem:[#allocation2 + $0x38] sm:$0xff] %vm19_vm0, %v927_v48 }
   0x9   :  { %833 = vmatpush3.bf16.msra.mxu1 %v878_v7  ;;  %794 = vmatprep.subr.bf16.mxu0 %v879_v8  ;;  %v895_v24 = vld [vmem:[%s1361_s1 + $0x70] sm:$0xff]   ;;  %v899_v28 = vld [vmem:[%s1361_s1 + $0x78] sm:$0xff]   ;;  %34 = vst.msk [vmem:[%s1363_s3] sm:$0xff] %vm33_vm1, %v927_v48  ;;  %35 = vst.msk [vmem:[%s1363_s3 + $0x8] sm:$0xff] %vm33_vm1, %v927_v48 }
   0xa   :  { %834 = vmatprep.subr.bf16.mxu1 %v880_v9  ;;  %v896_v25 = vld [vmem:[%s1361_s1 + $0xf0] sm:$0xff]   ;;  %v900_v29 = vld [vmem:[%s1361_s1 + $0xf8] sm:$0xff]   ;;  %36 = vst.msk [vmem:[%s1363_s3 + $0x10] sm:$0xff] %vm33_vm1, %v927_v48  ;;  %37 = vst.msk [vmem:[%s1363_s3 + $0x18] sm:$0xff] %vm33_vm1, %v927_v48 }
   0xb   :  { %v897_v26 = vld [vmem:[%s1361_s1 + $0x30] sm:$0xff]   ;;  %v901_v30 = vld [vmem:[%s1361_s1 + $0x38] sm:$0xff]   ;;  %38 = vst.msk [vmem:[%s1363_s3 + $0x20] sm:$0xff] %vm33_vm1, %v927_v48  ;;  %39 = vst.msk [vmem:[%s1363_s3 + $0x28] sm:$0xff] %vm33_vm1, %v927_v48 }
   0xc   :  { %795 = vmatpush3.bf16.msra.mxu0 %v881_v10  ;;  %v898_v27 = vld [vmem:[%s1361_s1 + $0xb0] sm:$0xff]   ;;  %v902_v31 = vld [vmem:[%s1361_s1 + $0xb8] sm:$0xff]   ;;  %40 = vst.msk [vmem:[%s1363_s3 + $0x30] sm:$0xff] %vm33_vm1, %v927_v48  ;;  %41 = vst.msk [vmem:[%s1363_s3 + $0x38] sm:$0xff] %vm33_vm1, %v927_v48 }
   0xd   :  { %835 = vmatpush3.bf16.msra.mxu1 %v882_v11  ;;  %796 = vmatprep.subr.bf16.mxu0 %v883_v12  ;;  %v903_v32 = vld [vmem:[%s1362_s0] ss:$16 sps:$4 sm:$0xff]   ;;  %v905_v33 = vld [vmem:[%s1362_s0 + $0x4] ss:$16 sps:$4 sm:$0xff]   ;;  %v906_v34 = vld [vmem:[%s1362_s0 + $0x8] ss:$16 sps:$4 sm:$0xff]  }
   0xe   :  { %836 = vmatprep.subr.bf16.mxu1 %v884_v13  ;;  %v908_v35 = vld [vmem:[%s1362_s0 + $0xc] ss:$16 sps:$4 sm:$0xff]   ;;  %442 = vmatprep.mubr.bf16.mxu0 %v905_v33  ;;  %v909_v36 = vld [vmem:[%s1362_s0 + $0x24] ss:$16 sps:$4 sm:$0xff]   ;;  %v913_v38 = vld [vmem:[%s1362_s0 + $0x20] ss:$16 sps:$4 sm:$0xff]  }
   0xf   :  { %507 = vmatprep.mubr.bf16.mxu1 %v908_v35  ;;  %v911_v37 = vld [vmem:[%s1362_s0 + $0x2c] ss:$16 sps:$4 sm:$0xff]   ;;  %v914_v39 = vld [vmem:[%s1362_s0 + $0x28] ss:$16 sps:$4 sm:$0xff]   ;;  %v915_v40 = vld [vmem:[%s1362_s0 + $0x44] ss:$16 sps:$4 sm:$0xff]  }
  0x10   :  { %797 = vmatpush3.bf16.msra.mxu0 %v885_v14  ;;  %v917_v41 = vld [vmem:[%s1362_s0 + $0x4c] ss:$16 sps:$4 sm:$0xff]   ;;  %v919_v42 = vld [vmem:[%s1362_s0 + $0x40] ss:$16 sps:$4 sm:$0xff]   ;;  %v920_v43 = vld [vmem:[%s1362_s0 + $0x48] ss:$16 sps:$4 sm:$0xff]  }
  0x11   :  { %837 = vmatpush3.bf16.msra.mxu1 %v886_v15  ;;  %798 = vmatprep.subr.bf16.mxu0 %v887_v16  ;;  %v921_v44 = vld [vmem:[%s1362_s0 + $0x64] ss:$16 sps:$4 sm:$0xff]   ;;  %v923_v45 = vld [vmem:[%s1362_s0 + $0x6c] ss:$16 sps:$4 sm:$0xff]   ;;  %v925_v46 = vld [vmem:[%s1362_s0 + $0x60] ss:$16 sps:$4 sm:$0xff]  }
  0x12   :  { %838 = vmatprep.subr.bf16.mxu1 %v888_v17  ;;  %v926_v47 = vld [vmem:[%s1362_s0 + $0x68] ss:$16 sps:$4 sm:$0xff]   ;;  %v50_v58 = vld [vmem:[#allocation2] sm:$0xff]  ;;  %v52_v12 = vld [vmem:[#allocation2 + $0x10] sm:$0xff]  ;;  %43 = vst.msk [vmem:[%s1365_s4 + $0x8] sm:$0xff] %vm33_vm1, %v927_v48 }
  0x13   :  { %v51_v63 = vld [vmem:[#allocation2 + $0x8] sm:$0xff]  ;;  %v53_v17 = vld [vmem:[#allocation2 + $0x18] sm:$0xff]  ;;  %42 = vst.msk [vmem:[%s1365_s4] sm:$0xff] %vm33_vm1, %v927_v48  ;;  %44 = vst.msk [vmem:[%s1365_s4 + $0x10] sm:$0xff] %vm33_vm1, %v927_v48 }
  0x14   :  { %799 = vmatpush3.bf16.msra.mxu0 %v889_v18  ;;  %45 = vst.msk [vmem:[%s1365_s4 + $0x18] sm:$0xff] %vm33_vm1, %v927_v48  ;;  %46 = vst.msk [vmem:[%s1365_s4 + $0x20] sm:$0xff] %vm33_vm1, %v927_v48 }
  0x15   :  { %839 = vmatpush3.bf16.msra.mxu1 %v890_v19  ;;  %800 = vmatprep.subr.bf16.mxu0 %v891_v20  ;;  %47 = vst.msk [vmem:[%s1365_s4 + $0x28] sm:$0xff] %vm33_vm1, %v927_v48  ;;  %48 = vst.msk [vmem:[%s1365_s4 + $0x30] sm:$0xff] %vm33_vm1, %v927_v48 }
  0x16   :  { %840 = vmatprep.subr.bf16.mxu1 %v892_v21  ;;  %49 = vst.msk [vmem:[%s1365_s4 + $0x38] sm:$0xff] %vm33_vm1, %v927_v48 }
  0x18   :  { %801 = vmatpush3.bf16.msra.mxu0 %v893_v22 }
  0x19   :  { %841 = vmatpush3.bf16.msra.mxu1 %v894_v23  ;;  %802 = vmatprep.subr.bf16.mxu0 %v895_v24 }
  0x1a   :  { %842 = vmatprep.subr.bf16.mxu1 %v896_v25 }
  0x1c   :  { %803 = vmatpush3.bf16.msra.mxu0 %v897_v26 }
  0x1d   :  { %843 = vmatpush3.bf16.msra.mxu1 %v898_v27  ;;  %804 = vmatprep.subr.bf16.mxu0 %v899_v28 }
  0x1e   :  { %844 = vmatprep.subr.bf16.mxu1 %v900_v29 }
  0x20   :  { %805 = vmatpush3.bf16.msra.mxu0 %v901_v30 }
  0x21   :  { %845 = vmatpush3.bf16.msra.mxu1 %v902_v31 }
  0x23   :  { %443 = vmatmul.mubr.bf16.vlgmr.msra.gmra.mrb[0].mxu0 %v903_v32 }
  0x24   :  { %508 = vmatmul.mubr.bf16.vlgmr.msra.gmra.mrb[0].mxu1 %v906_v34  ;;  %450 = vmatprep.mubr.bf16.mxu0 %v909_v36  ;;  %v54_v36 = vld [vmem:[#allocation2 + $0x20] sm:$0xff] }
  0x25   :  { %515 = vmatprep.mubr.bf16.mxu1 %v911_v37 }
  0x2b   :  { %451 = vmatmul.mubr.bf16.gmra.mrb[4].mxu0 %v913_v38 }
  0x2c   :  { %516 = vmatmul.mubr.bf16.gmra.mrb[4].mxu1 %v914_v39  ;;  %458 = vmatprep.mubr.bf16.mxu0 %v915_v40 }
  0x2d   :  { %523 = vmatprep.mubr.bf16.mxu1 %v917_v41 }
  0x33   :  { %459 = vmatmul.mubr.bf16.gmra.mrb[8].mxu0 %v919_v42 }
  0x34   :  { %524 = vmatmul.mubr.bf16.gmra.mrb[8].mxu1 %v920_v43  ;;  %466 = vmatprep.mubr.bf16.mxu0 %v921_v44  ;;  %v55_v44 = vld [vmem:[#allocation2 + $0x28] sm:$0xff] }
  0x35   :  { %531 = vmatprep.mubr.bf16.mxu1 %v923_v45 }
  0x3b   :  { %467 = vmatmul.mubr.bf16.gmra.mrb[12].mxu0 %v925_v46 }
  0x3c   :  { %532 = vmatmul.mubr.bf16.gmra.mrb[12].mxu1 %v926_v47 }
  0xf6   :  { %v806_v49 = vpop.f32.mrb[0].mxu0 }
  0xf7   :  { %v846_v50 = vpop.f32.mrb[0].mxu1  ;;  %v807_v51 = vpop.f32.mrb[1].mxu0 }
  0xf8   :  { %v808_v52 = vadd.f32 %v807_v51, %v806_v49  ;;  %v847_v53 = vpop.f32.mrb[1].mxu1  ;;  %v809_v54 = vpop.f32.mrb[2].mxu0 }
  0xf9   :  { %v848_v55 = vadd.f32 %v847_v53, %v846_v50  ;;  %v849_v56 = vpop.f32.mrb[2].mxu1  ;;  %v810_v57 = vpop.f32.mrb[3].mxu0 }
  0xfa   :  { %v811_v59 = vadd.f32 %v810_v57, %v809_v54  ;;  %v850_v60 = vpop.f32.mrb[3].mxu1 }
  0xfb   :  { %v510_v61 = vadd.f32 %v848_v55, %v808_v52  ;;  %v851_v62 = vadd.f32 %v850_v60, %v849_v56 }
  0xfd   :  { %v540_v0 = vadd.f32 %v510_v61, %v50_v58  ;;  %v513_v1 = vadd.f32 %v851_v62, %v811_v59 }
  0xfe   :  { %v812_v2 = vpop.f32.mrb[4].mxu0 }
  0xff   :  { %549 = vst.msk [vmem:[#allocation2] sm:$0xff] %vm19_vm0, %v540_v0  ;;  %v541_v3 = vadd.f32 %v513_v1, %v51_v63  ;;  %v852_v4 = vpop.f32.mrb[4].mxu1  ;;  %v813_v5 = vpop.f32.mrb[5].mxu0  ;;  %v56_v1 = vld [vmem:[#allocation2 + $0x30] sm:$0xff] }
 0x100   :  { %v814_v6 = vadd.f32 %v813_v5, %v812_v2  ;;  %v853_v7 = vpop.f32.mrb[5].mxu1  ;;  %v815_v8 = vpop.f32.mrb[6].mxu0 }
 0x101   :  { %550 = vst.msk [vmem:[#allocation2 + $0x8] sm:$0xff] %vm19_vm0, %v541_v3  ;;  %v854_v9 = vadd.f32 %v853_v7, %v852_v4  ;;  %v855_v10 = vpop.f32.mrb[6].mxu1  ;;  %v816_v11 = vpop.f32.mrb[7].mxu0 }
 0x102   :  { %v817_v13 = vadd.f32 %v816_v11, %v815_v8  ;;  %v856_v14 = vpop.f32.mrb[7].mxu1 }
 0x103   :  { %v518_v15 = vadd.f32 %v854_v9, %v814_v6  ;;  %v857_v16 = vadd.f32 %v856_v14, %v855_v10  ;;  %v57_v9 = vld [vmem:[#allocation2 + $0x38] sm:$0xff] }
 0x105   :  { %v542_v18 = vadd.f32 %v518_v15, %v52_v12  ;;  %v521_v19 = vadd.f32 %v857_v16, %v817_v13 }
 0x106   :  { %v818_v20 = vpop.f32.mrb[8].mxu0  ;;  %v560_v21 = vld [vmem:[#allocation2] sm:$0xff] }
 0x107   :  { %551 = vst.msk [vmem:[#allocation2 + $0x10] sm:$0xff] %vm19_vm0, %v542_v18  ;;  %v543_v22 = vadd.f32 %v521_v19, %v53_v17  ;;  %v858_v23 = vpop.f32.mrb[8].mxu1  ;;  %v819_v24 = vpop.f32.mrb[9].mxu0  ;;  %v576_v25 = vsel %vm19_vm0, %v560_v21, 0.0  ;;  %v782_v26 = vpack.c.bf16 %v560_v21, %v560_v21  ;;  %v625_v39 = vmul.f32 %v560_v21, %v560_v21 }
 0x108   :  { %v820_v27 = vadd.f32 %v819_v24, %v818_v20  ;;  %v859_v28 = vpop.f32.mrb[9].mxu1  ;;  %577 = vadd.xlane.f32.xlu0 %v576_v25  ;;  %v821_v29 = vpop.f32.mrb[10].mxu0  ;;  %v561_v30 = vld [vmem:[#allocation2 + $0x8] sm:$0xff] }
 0x109   :  { %552 = vst.msk [vmem:[#allocation2 + $0x18] sm:$0xff] %vm19_vm0, %v543_v22  ;;  %v860_v31 = vadd.f32 %v859_v28, %v858_v23  ;;  %v861_v32 = vpop.f32.mrb[10].mxu1  ;;  %v822_v33 = vpop.f32.mrb[11].mxu0  ;;  %v626_v34 = vmul.f32 %v561_v30, %v561_v30  ;;  %v783_v35 = vpack.c.bf16 %v561_v30, %v561_v30  ;;  %v579_v43 = vsel %vm19_vm0, %v561_v30, 0.0 }
 0x10a   :  { %706 = vst.msk [vmem:[%s1364_s2] sm:$0xf] %vm705_vm2, %v782_v26  ;;  %v823_v37 = vadd.f32 %v822_v33, %v821_v29  ;;  %v862_v38 = vpop.f32.mrb[11].mxu1  ;;  %v633_v50 = vsel %vm19_vm0, %v625_v39, 0.0  ;;  %v568_v33 = vld [vmem:[%s1363_s3] sm:$0xff] }
 0x10b   :  { %v526_v40 = vadd.f32 %v860_v31, %v820_v27  ;;  %v863_v41 = vadd.f32 %v862_v38, %v861_v32  ;;  %v636_v42 = vsel %vm19_vm0, %v626_v34, 0.0  ;;  %707 = vst.msk [vmem:[%s1364_s2 + $0x4] sm:$0xf] %vm705_vm2, %v783_v35 }
 0x10c   :  { %637 = vadd.xlane.f32.xlu1 %v636_v42  ;;  %580 = vadd.xlane.f32.xlu0 %v579_v43  ;;  %v570_v42 = vld [vmem:[%s1363_s3 + $0x10] sm:$0xff]  ;;  %v617_v43 = vld [vmem:[%s1365_s4] sm:$0xff] }
 0x10d   :  { %v544_v45 = vadd.f32 %v526_v40, %v54_v36  ;;  %v529_v46 = vadd.f32 %v863_v41, %v823_v37  ;;  %v618_v36 = vld [vmem:[%s1365_s4 + $0x8] sm:$0xff] }
 0x10e   :  { %v824_v47 = vpop.f32.mrb[12].mxu0  ;;  %v562_v49 = vld [vmem:[#allocation2 + $0x10] sm:$0xff]  ;;  %v569_v37 = vld [vmem:[%s1363_s3 + $0x8] sm:$0xff] }
 0x10f   :  { %553 = vst.msk [vmem:[#allocation2 + $0x20] sm:$0xff] %vm19_vm0, %v544_v45  ;;  %v545_v51 = vadd.f32 %v529_v46, %v55_v44  ;;  %v864_v52 = vpop.f32.mrb[12].mxu1  ;;  %v825_v53 = vpop.f32.mrb[13].mxu0  ;;  %v582_v54 = vsel %vm19_vm0, %v562_v49, 0.0  ;;  %v784_v55 = vpack.c.bf16 %v562_v49, %v562_v49  ;;  %v627_v56 = vmul.f32 %v562_v49, %v562_v49  ;;  %v571_v49 = vld [vmem:[%s1363_s3 + $0x18] sm:$0xff] }
 0x110   :  { %v826_v57 = vadd.f32 %v825_v53, %v824_v47  ;;  %v865_v58 = vpop.f32.mrb[13].mxu1  ;;  %583 = vadd.xlane.f32.xlu1 %v582_v54  ;;  %634 = vadd.xlane.f32.xlu0 %v633_v50  ;;  %v827_v59 = vpop.f32.mrb[14].mxu0  ;;  %v563_v60 = vld [vmem:[#allocation2 + $0x18] sm:$0xff]  ;;  %v619_v50 = vld [vmem:[%s1365_s4 + $0x10] sm:$0xff] }
 0x111   :  { %554 = vst.msk [vmem:[#allocation2 + $0x28] sm:$0xff] %vm19_vm0, %v545_v51  ;;  %v866_v61 = vadd.f32 %v865_v58, %v864_v52  ;;  %v867_v62 = vpop.f32.mrb[14].mxu1  ;;  %v828_v63 = vpop.f32.mrb[15].mxu0  ;;  %v785_v0 = vpack.c.bf16 %v563_v60, %v563_v60  ;;  %v628_v4 = vmul.f32 %v563_v60, %v563_v60  ;;  %v585_v7 = vsel %vm19_vm0, %v563_v60, 0.0 }
 0x112   :  { %708 = vst.msk [vmem:[%s1364_s2 + $0x8] sm:$0xf] %vm705_vm2, %v784_v55  ;;  %v829_v2 = vadd.f32 %v828_v63, %v827_v59  ;;  %v868_v3 = vpop.f32.mrb[15].mxu1  ;;  %v639_v8 = vsel %vm19_vm0, %v627_v56, 0.0  ;;  %v620_v55 = vld [vmem:[%s1365_s4 + $0x18] sm:$0xff]  ;;  %v572_v56 = vld [vmem:[%s1363_s3 + $0x20] sm:$0xff] }
 0x113   :  { %v534_v5 = vadd.f32 %v866_v61, %v826_v57  ;;  %v869_v6 = vadd.f32 %v868_v3, %v867_v62  ;;  %709 = vst.msk [vmem:[%s1364_s2 + $0xc] sm:$0xf] %vm705_vm2, %v785_v0  ;;  %v642_v12 = vsel %vm19_vm0, %v628_v4, 0.0  ;;  %v573_v61 = vld [vmem:[%s1363_s3 + $0x28] sm:$0xff]  ;;  %v621_v62 = vld [vmem:[%s1365_s4 + $0x20] sm:$0xff]  ;;  %v574_v4 = vld [vmem:[%s1363_s3 + $0x30] sm:$0xff] }
 0x114   :  { %586 = vadd.xlane.f32.xlu1 %v585_v7  ;;  %640 = vadd.xlane.f32.xlu0 %v639_v8  ;;  %v622_v3 = vld [vmem:[%s1365_s4 + $0x28] sm:$0xff] }
 0x115   :  { %v546_v10 = vadd.f32 %v534_v5, %v56_v1  ;;  %v537_v11 = vadd.f32 %v869_v6, %v829_v2 }
 0x116   :  { %v564_v13 = vld [vmem:[#allocation2 + $0x20] sm:$0xff] }
 0x117   :  { %555 = vst.msk [vmem:[#allocation2 + $0x30] sm:$0xff] %vm19_vm0, %v546_v10  ;;  %v547_v14 = vadd.f32 %v537_v11, %v57_v9  ;;  %v588_v15 = vsel %vm19_vm0, %v564_v13, 0.0  ;;  %v786_v16 = vpack.c.bf16 %v564_v13, %v564_v13  ;;  %v629_v17 = vmul.f32 %v564_v13, %v564_v13  ;;  %v575_v9 = vld [vmem:[%s1363_s3 + $0x38] sm:$0xff]  ;;  %v623_v10 = vld [vmem:[%s1365_s4 + $0x30] sm:$0xff] }
 0x118   :  { %643 = vadd.xlane.f32.xlu1 %v642_v12  ;;  %589 = vadd.xlane.f32.xlu0 %v588_v15  ;;  %v565_v18 = vld [vmem:[#allocation2 + $0x28] sm:$0xff]  ;;  %v624_v15 = vld [vmem:[%s1365_s4 + $0x38] sm:$0xff] }
 0x119   :  { %556 = vst.msk [vmem:[#allocation2 + $0x38] sm:$0xff] %vm19_vm0, %v547_v14  ;;  %v787_v48 = vpack.c.bf16 %v565_v18, %v565_v18  ;;  %v645_v19 = vsel %vm19_vm0, %v629_v17, 0.0  ;;  %v591_v20 = vsel %vm19_vm0, %v565_v18, 0.0  ;;  %v630_v21 = vmul.f32 %v565_v18, %v565_v18 }
 0x11a   :  { %710 = vst.msk [vmem:[%s1364_s2 + $0x10] sm:$0xf] %vm705_vm2, %v786_v16 }
 0x11b   :  { %711 = vst.msk [vmem:[%s1364_s2 + $0x14] sm:$0xf] %vm705_vm2, %v787_v48  ;;  %v648_v23 = vsel %vm19_vm0, %v630_v21, 0.0 }
 0x11c   :  { %592 = vadd.xlane.f32.xlu1 %v591_v20  ;;  %646 = vadd.xlane.f32.xlu0 %v645_v19 }
 0x11e   :  { %v566_v22 = vld [vmem:[#allocation2 + $0x30] sm:$0xff] }
 0x11f   :  { %v594_v24 = vsel %vm19_vm0, %v566_v22, 0.0  ;;  %v788_v25 = vpack.c.bf16 %v566_v22, %v566_v22  ;;  %v631_v26 = vmul.f32 %v566_v22, %v566_v22 }
 0x120   :  { %649 = vadd.xlane.f32.xlu1 %v648_v23  ;;  %595 = vadd.xlane.f32.xlu0 %v594_v24  ;;  %v567_v27 = vld [vmem:[#allocation2 + $0x38] sm:$0xff] }
 0x121   :  { %712 = vst.msk [vmem:[%s1364_s2 + $0x18] sm:$0xf] %vm705_vm2, %v788_v25  ;;  %v789_v28 = vpack.c.bf16 %v567_v27, %v567_v27  ;;  %v651_v29 = vsel %vm19_vm0, %v631_v26, 0.0  ;;  %v597_v30 = vsel %vm19_vm0, %v567_v27, 0.0  ;;  %v632_v31 = vmul.f32 %v567_v27, %v567_v27 }
 0x123   :  { %713 = vst.msk [vmem:[%s1364_s2 + $0x1c] sm:$0xf] %vm705_vm2, %v789_v28  ;;  %v654_v32 = vsel %vm19_vm0, %v632_v31, 0.0 }
 0x124   :  { %598 = vadd.xlane.f32.xlu1 %v597_v30  ;;  %652 = vadd.xlane.f32.xlu0 %v651_v29 }
 0x128   :  { %655 = vadd.xlane.f32.xlu1 %v654_v32 }
 0x195   :  { %v578_v34 = vpop.xlane.xlu0 %577 }
 0x196   :  { %v600_v35 = vadd.f32 %v578_v34, %v568_v33 }
 0x198   :  { %609 = vst.msk [vmem:[%s1363_s3] sm:$0xff] %vm33_vm1, %v600_v35 }
 0x199   :  { %v638_v38 = vpop.xlane.xlu1 %637  ;;  %v581_v39 = vpop.xlane.xlu0 %580 }
 0x19a   :  { %v658_v40 = vadd.f32 %v638_v38, %v618_v36  ;;  %v601_v41 = vadd.f32 %v581_v39, %v569_v37 }
 0x19c   :  { %666 = vst.msk [vmem:[%s1365_s4 + $0x8] sm:$0xff] %vm33_vm1, %v658_v40  ;;  %610 = vst.msk [vmem:[%s1363_s3 + $0x8] sm:$0xff] %vm33_vm1, %v601_v41 }
 0x19d   :  { %v584_v44 = vpop.xlane.xlu1 %583  ;;  %v635_v45 = vpop.xlane.xlu0 %634 }
 0x19e   :  { %v602_v46 = vadd.f32 %v584_v44, %v570_v42  ;;  %v657_v47 = vadd.f32 %v635_v45, %v617_v43 }
 0x1a0   :  { %611 = vst.msk [vmem:[%s1363_s3 + $0x10] sm:$0xff] %vm33_vm1, %v602_v46  ;;  %665 = vst.msk [vmem:[%s1365_s4] sm:$0xff] %vm33_vm1, %v657_v47 }
 0x1a1   :  { %v587_v51 = vpop.xlane.xlu1 %586  ;;  %v641_v52 = vpop.xlane.xlu0 %640 }
 0x1a2   :  { %v603_v53 = vadd.f32 %v587_v51, %v571_v49  ;;  %v659_v54 = vadd.f32 %v641_v52, %v619_v50 }
 0x1a4   :  { %612 = vst.msk [vmem:[%s1363_s3 + $0x18] sm:$0xff] %vm33_vm1, %v603_v53  ;;  %667 = vst.msk [vmem:[%s1365_s4 + $0x10] sm:$0xff] %vm33_vm1, %v659_v54 }
 0x1a5   :  { %v644_v57 = vpop.xlane.xlu1 %643  ;;  %v590_v58 = vpop.xlane.xlu0 %589 }
 0x1a6   :  { %v660_v59 = vadd.f32 %v644_v57, %v620_v55  ;;  %v604_v60 = vadd.f32 %v590_v58, %v572_v56 }
 0x1a8   :  { %668 = vst.msk [vmem:[%s1365_s4 + $0x18] sm:$0xff] %vm33_vm1, %v660_v59  ;;  %613 = vst.msk [vmem:[%s1363_s3 + $0x20] sm:$0xff] %vm33_vm1, %v604_v60 }
 0x1a9   :  { %v593_v63 = vpop.xlane.xlu1 %592  ;;  %v647_v0 = vpop.xlane.xlu0 %646 }
 0x1aa   :  { %v605_v1 = vadd.f32 %v593_v63, %v573_v61  ;;  %v661_v2 = vadd.f32 %v647_v0, %v621_v62 }
 0x1ac   :  { %614 = vst.msk [vmem:[%s1363_s3 + $0x28] sm:$0xff] %vm33_vm1, %v605_v1  ;;  %669 = vst.msk [vmem:[%s1365_s4 + $0x20] sm:$0xff] %vm33_vm1, %v661_v2 }
 0x1ad   :  { %v650_v5 = vpop.xlane.xlu1 %649  ;;  %v596_v6 = vpop.xlane.xlu0 %595 }
 0x1ae   :  { %v662_v7 = vadd.f32 %v650_v5, %v622_v3  ;;  %v606_v8 = vadd.f32 %v596_v6, %v574_v4 }
 0x1b0   :  { %670 = vst.msk [vmem:[%s1365_s4 + $0x28] sm:$0xff] %vm33_vm1, %v662_v7  ;;  %615 = vst.msk [vmem:[%s1363_s3 + $0x30] sm:$0xff] %vm33_vm1, %v606_v8 }
 0x1b1   :  { %v599_v11 = vpop.xlane.xlu1 %598  ;;  %v653_v12 = vpop.xlane.xlu0 %652 }
 0x1b2   :  { %v607_v13 = vadd.f32 %v599_v11, %v575_v9  ;;  %v663_v14 = vadd.f32 %v653_v12, %v623_v10 }
 0x1b4   :  { %616 = vst.msk [vmem:[%s1363_s3 + $0x38] sm:$0xff] %vm33_vm1, %v607_v13  ;;  %671 = vst.msk [vmem:[%s1365_s4 + $0x30] sm:$0xff] %vm33_vm1, %v663_v14 }
 0x1b5   :  { %v656_v16 = vpop.xlane.xlu1 %655 }
 0x1b6   :  { %v664_v17 = vadd.f32 %v656_v16, %v624_v15 }
 0x1b8   :  { %672 = vst.msk [vmem:[%s1365_s4 + $0x38] sm:$0xff] %vm33_vm1, %v664_v17 }

</bundles_post_ra>
